<compile_context>
chip_gen: v7x
topology: tpu7x:2x2x1
jax: 0.10.0
libtpu: 0.0.40
codegen_flags: <defaults>
</compile_context>

<pallas_src>
import jax
import jax.numpy as jnp
import numpy as np
from jax import lax
from jax.experimental import pallas as pl
from jax.experimental.pallas import tpu as pltpu


def _round_up(x, m):
    return ((x + m - 1) // m) * m


# ----------------------------------------------------------------------------
# Pallas kernel: (f32 rows) -> bf16 cast -> Linear -> Softplus -> Linear,
# then masked sigmoid/rescale on the rgb lanes only.  Single lane-dense
# merged output tile (TM, 1 + decoder_output_dim).
# ----------------------------------------------------------------------------
def _osg_decoder_kernel(x_ref, w1_ref, b1_ref, w2_ref, b2_ref, out_ref):
    # bf16 MXU operands, f32 accumulation.  Cast happens in-kernel so the HBM
    # stream for x stays in its producer dtype (no extra XLA pass).
    x = x_ref[...].astype(jnp.bfloat16)
    h = jnp.dot(x, w1_ref[...], preferred_element_type=jnp.float32)
    h = h + b1_ref[...]                                           # (TM, H) f32

    # Numerically-stable Softplus in f32 (v5e EUP is f32-only).  2 EUP ops per
    # hidden element; re-profile EUP slot on v5e after the HBM fixes.
    h = jnp.maximum(h, 0.0) + jnp.log1p(jnp.exp(-jnp.abs(h)))

    # Layer 2: bf16 operands, f32 accumulation.
    o = jnp.dot(h.astype(w2_ref.dtype), w2_ref[...],
                preferred_element_type=jnp.float32)
    o = o + b2_ref[...]                                           # (TM, 1+32)

    # Column 0 is sigma (raw); columns 1.. are rgb (sigmoid * 1.002 - 0.001).
    # Lane-mask select instead of cross-lane slicing.
    col = lax.broadcasted_iota(jnp.int32, o.shape, 1)
    rgb = jax.nn.sigmoid(o) * (1.0 + 2.0 * 0.001) - 0.001
    out_ref[...] = jnp.where(col == 0, o, rgb).astype(out_ref.dtype)


def _choose_tile_m(M, tile_m):
    # Keep >= ~4 grid steps when the problem is big enough (feeds both v7x
    # TensorCores / overlaps DMA), never below 512 rows/step for overhead
    # amortization, and never above the (8-aligned) problem size.
    tile_m = min(tile_m, max(512, _round_up(-(-M // 4), 8)))
    tile_m = max(8, min(tile_m, _round_up(M, 8)))
    return tile_m


def osg_decoder_pallas(point_features, w1, b1, w2, b2, *,
                       tile_m=4096, out_dtype=jnp.float32):
    """OSGDecoder MLP — returns the merged (N, R*K, 1+decoder_output_dim)
    tensor (sigma in channel 0, pre-split rgb in channels 1..)."""
    N, R, K, C = point_features.shape
    M = N * R * K
    H = w1.shape[1]
    O = w2.shape[1]          # 1 + decoder_output_dim

    tile_m = _choose_tile_m(M, tile_m)
    grid = (pl.cdiv(M, tile_m),)   # ragged last tile handled by edge masking

    # Contiguous reshape only — no dtype cast, no pad (both were extra HBM
    # passes over the dominant stream).
    x = point_features.reshape(M, C)
    w1_bf = w1.astype(jnp.bfloat16)          # weights tiny; resident in VMEM
    w2_bf = w2.astype(jnp.bfloat16)
    b1_2d = b1.reshape(1, H).astype(jnp.float32)
    b2_2d = b2.reshape(1, O).astype(jnp.float32)

    x_bytes = int(np.dtype(x.dtype).itemsize)
    o_bytes = int(np.dtype(out_dtype).itemsize)
    cost = pl.CostEstimate(
        flops=2 * M * (C * H + H * O),
        transcendentals=M * (2 * H + O),      # softplus exp+log + sigmoid
        bytes_accessed=(M * C * x_bytes + M * O * o_bytes
                        + (C * H + H * O) * 2 + (H + O) * 4),
    )

    out_flat = pl.pallas_call(
        _osg_decoder_kernel,
        out_shape=jax.ShapeDtypeStruct((M, O), out_dtype),
        grid_spec=pltpu.PrefetchScalarGridSpec(
            num_scalar_prefetch=0,
            grid=grid,
            in_specs=[
                pl.BlockSpec((tile_m, C), lambda i: (i, 0)),   # x rows (f32)
                pl.BlockSpec((C, H), lambda i: (0, 0)),        # W1 (resident)
                pl.BlockSpec((1, H), lambda i: (0, 0)),        # b1 (f32)
                pl.BlockSpec((H, O), lambda i: (0, 0)),        # W2 (resident)
                pl.BlockSpec((1, O), lambda i: (0, 0)),        # b2 (f32)
            ],
            out_specs=pl.BlockSpec((tile_m, O), lambda i: (i, 0)),
        ),
        compiler_params=pltpu.CompilerParams(
            dimension_semantics=("parallel",)),
        cost_estimate=cost,
    )(x, w1_bf, b1_2d, w2_bf, b2_2d)

    # Match torch: x.view(N, -1, x.shape[-1]).  No channel slicing here — the
    # merged tensor is returned so the renderer can consume/fuse it directly.
    return out_flat.reshape(N, R * K, O)


def osg_decoder_forward(point_features, w1, b1, w2, b2, **kw):
    """API-parity wrapper returning {'rgb', 'sigma'}.  The channel slices are
    consumer-side XLA ops; prefer consuming the merged tensor on the hot path."""
    merged = osg_decoder_pallas(point_features, w1, b1, w2, b2, **kw)
    return {"rgb": merged[..., 1:], "sigma": merged[..., 0:1]}


# ----------------------------------------------------------------------------
# Parameter setup (EG3D FullyConnectedLayer semantics, lr_multiplier = 1):
#   weight ~ randn(out, in) / lr_mul ; effective w = weight * lr_mul / sqrt(in)
#   bias init 0 ; effective b = bias * lr_mul
# Gains folded into stored (in, out)-layout matrices (plain JAX glue).
# ----------------------------------------------------------------------------
def make_osg_decoder_params(key, n_features=64, hidden_dim=64,
                            decoder_output_dim=32, lr_mul=1.0):
    k1, k2 = jax.random.split(key)
    out_dim = 1 + decoder_output_dim

    w1_raw = jax.random.normal(k1, (hidden_dim, n_features), jnp.float32) / lr_mul
    w1 = (w1_raw * (lr_mul / np.sqrt(n_features))).T         # (C, H)
    b1 = jnp.zeros((hidden_dim,), jnp.float32) * lr_mul

    w2_raw = jax.random.normal(k2, (out_dim, hidden_dim), jnp.float32) / lr_mul
    w2 = (w2_raw * (lr_mul / np.sqrt(hidden_dim))).T          # (H, O)
    b2 = jnp.zeros((out_dim,), jnp.float32) * lr_mul
    return w1, b1, w2, b2


# Pure-JAX reference emulating the kernel's bf16-operand / f32-accumulate path.
def osg_decoder_ref(point_features, w1, b1, w2, b2):
    N, R, K, C = point_features.shape
    x = point_features.reshape(-1, C).astype(jnp.bfloat16).astype(jnp.float32)
    w1f = w1.astype(jnp.bfloat16).astype(jnp.float32)
    w2f = w2.astype(jnp.bfloat16).astype(jnp.float32)
    h = x @ w1f + b1
    h = jnp.logaddexp(h, 0.0)                     # Softplus
    h = h.astype(jnp.bfloat16).astype(jnp.float32)
    o = h @ w2f + b2
    o = o.reshape(N, -1, o.shape[-1])
    rgb = jax.nn.sigmoid(o[..., 1:]) * (1 + 2 * 0.001) - 0.001
    sigma = o[..., 0:1]
    return {"rgb": rgb, "sigma": sigma}


if __name__ == "__main__":
    key = jax.random.PRNGKey(0)
    k_feat, k_params = jax.random.split(key)

    # Small shapes: batch N=2, R=16 rays, K=8 samples/ray, C=64 plane features
    # (xyz_pe=False -> fc_head input dim = 64; decoder_output_dim = 32).
    N, R, K, C = 2, 16, 8, 64
    point_features = jax.random.normal(k_feat, (N, R, K, C), jnp.float32)

    w1, b1, w2, b2 = make_osg_decoder_params(
        k_params, n_features=C, hidden_dim=64, decoder_output_dim=32)

    out = osg_decoder_forward(point_features, w1, b1, w2, b2)
    jax.block_until_ready(out)

    ref = osg_decoder_ref(point_features, w1, b1, w2, b2)
    np.testing.assert_allclose(np.asarray(out["sigma"]),
                               np.asarray(ref["sigma"]), rtol=5e-3, atol=5e-3)
    np.testing.assert_allclose(np.asarray(out["rgb"]),
                               np.asarray(ref["rgb"]), rtol=5e-3, atol=5e-3)

    assert out["sigma"].shape == (N, R * K, 1)
    assert out["rgb"].shape == (N, R * K, 32)
    print("KERNEL_OK")
</pallas_src>

<mosaic_0001>
module attributes {stable_mosaic.version = 11 : i64} {
  func.func @_osg_decoder_kernel(%arg0: i32, %arg1: memref<256x64xf32, #tpu.memory_space<vmem>>, %arg2: memref<64x64xbf16, #tpu.memory_space<vmem>>, %arg3: memref<1x64xf32, #tpu.memory_space<vmem>>, %arg4: memref<64x33xbf16, #tpu.memory_space<vmem>>, %arg5: memref<1x33xf32, #tpu.memory_space<vmem>>, %arg6: memref<256x33xf32, #tpu.memory_space<vmem>>) attributes {dimension_semantics = [#tpu.dimension_semantics<parallel>], iteration_bounds = array<i64: 1>, scalar_prefetch = 0 : i64, scratch_operands = 0 : i64, tpu.core_type = #tpu.core_type<tc>, window_params = [{transform_indices = @transform_0, window_bounds = array<i64: 256, 64>}, {pipeline_mode = #tpu.pipeline_mode<synchronous>, transform_indices = @transform_1, window_bounds = array<i64: 64, 64>}, {pipeline_mode = #tpu.pipeline_mode<synchronous>, transform_indices = @transform_2, window_bounds = array<i64: 1, 64>}, {pipeline_mode = #tpu.pipeline_mode<synchronous>, transform_indices = @transform_3, window_bounds = array<i64: 64, 33>}, {pipeline_mode = #tpu.pipeline_mode<synchronous>, transform_indices = @transform_4, window_bounds = array<i64: 1, 33>}, {transform_indices = @transform_5, window_bounds = array<i64: 256, 33>}]} {
    %c0 = arith.constant 0 : index
    %c0_0 = arith.constant 0 : index
    %0 = vector.load %arg1[%c0, %c0_0] : memref<256x64xf32, #tpu.memory_space<vmem>>, vector<256x64xf32>
    %1 = arith.truncf %0 : vector<256x64xf32> to vector<256x64xbf16>
    %c0_1 = arith.constant 0 : index
    %c0_2 = arith.constant 0 : index
    %2 = vector.load %arg2[%c0_1, %c0_2] : memref<64x64xbf16, #tpu.memory_space<vmem>>, vector<64x64xbf16>
    %cst = arith.constant dense<0.000000e+00> : vector<256x64xf32>
    %3 = tpu.matmul %1, %2, %cst {dimension_numbers = #tpu.dot_dimension_numbers<[1], [0], [0], [1], [0, 0, 1, 1], [], []>} : vector<256x64xbf16>, vector<64x64xbf16>, vector<256x64xf32> -> vector<256x64xf32>
    %c0_3 = arith.constant 0 : index
    %c0_4 = arith.constant 0 : index
    %4 = vector.load %arg3[%c0_3, %c0_4] : memref<1x64xf32, #tpu.memory_space<vmem>>, vector<1x64xf32>
    %5 = vector.broadcast %4 : vector<1x64xf32> to vector<256x64xf32>
    %6 = arith.addf %3, %5 : vector<256x64xf32>
    %cst_5 = arith.constant 0.000000e+00 : f32
    %7 = vector.broadcast %cst_5 : f32 to vector<256x64xf32>
    %8 = arith.maximumf %6, %7 : vector<256x64xf32>
    %9 = math.absf %6 : vector<256x64xf32>
    %cst_6 = arith.constant 0.000000e+00 : f32
    %10 = vector.broadcast %cst_6 : f32 to vector<256x64xf32>
    %11 = arith.subf %10, %9 : vector<256x64xf32>
    %12 = math.exp %11 : vector<256x64xf32>
    %13 = math.log1p %12 : vector<256x64xf32>
    %14 = arith.addf %8, %13 : vector<256x64xf32>
    %15 = arith.truncf %14 : vector<256x64xf32> to vector<256x64xbf16>
    %c0_7 = arith.constant 0 : index
    %c0_8 = arith.constant 0 : index
    %16 = vector.load %arg4[%c0_7, %c0_8] : memref<64x33xbf16, #tpu.memory_space<vmem>>, vector<64x33xbf16>
    %cst_9 = arith.constant dense<0.000000e+00> : vector<256x33xf32>
    %17 = tpu.matmul %15, %16, %cst_9 {dimension_numbers = #tpu.dot_dimension_numbers<[1], [0], [0], [1], [0, 0, 1, 1], [], []>} : vector<256x64xbf16>, vector<64x33xbf16>, vector<256x33xf32> -> vector<256x33xf32>
    %c0_10 = arith.constant 0 : index
    %c0_11 = arith.constant 0 : index
    %18 = vector.load %arg5[%c0_10, %c0_11] : memref<1x33xf32, #tpu.memory_space<vmem>>, vector<1x33xf32>
    %19 = vector.broadcast %18 : vector<1x33xf32> to vector<256x33xf32>
    %20 = arith.addf %17, %19 : vector<256x33xf32>
    %21 = tpu.iota {dimensions = array<i32: 1>} : vector<256x33xi32>
    %22 = arith.negf %20 : vector<256x33xf32>
    %23 = math.exp %22 : vector<256x33xf32>
    %cst_12 = arith.constant 1.000000e+00 : f32
    %24 = vector.broadcast %cst_12 : f32 to vector<256x33xf32>
    %25 = arith.addf %24, %23 : vector<256x33xf32>
    %26 = arith.divf %24, %25 : vector<256x33xf32>
    %cst_13 = arith.constant 1.002000e+00 : f32
    %27 = vector.broadcast %cst_13 : f32 to vector<256x33xf32>
    %28 = arith.mulf %26, %27 : vector<256x33xf32>
    %cst_14 = arith.constant 1.000000e-03 : f32
    %29 = vector.broadcast %cst_14 : f32 to vector<256x33xf32>
    %30 = arith.subf %28, %29 : vector<256x33xf32>
    %c0_i32 = arith.constant 0 : i32
    %31 = vector.broadcast %c0_i32 : i32 to vector<256x33xi32>
    %32 = arith.cmpi eq, %21, %31 : vector<256x33xi32>
    %33 = arith.select %32, %20, %30 : vector<256x33xi1>, vector<256x33xf32>
    %c0_15 = arith.constant 0 : index
    %c0_16 = arith.constant 0 : index
    %34 = vector.load %arg6[%c0_15, %c0_16] : memref<256x33xf32, #tpu.memory_space<vmem>>, vector<256x33xf32>
    tpu.vector_store %arg6[%c0_15, %c0_16], %33 {strides = array<i32>} : memref<256x33xf32, #tpu.memory_space<vmem>>, vector<256x33xf32>,
    return
  }
  func.func @transform_0(%arg0: i32) -> (i32, i32) {
    %c0_i32 = arith.constant 0 : i32
    %c0_i32_0 = arith.constant 0 : i32
    return %arg0, %c0_i32 : i32, i32
  }
  func.func @transform_1(%arg0: i32) -> (i32, i32) {
    %c0_i32 = arith.constant 0 : i32
    %c0_i32_0 = arith.constant 0 : i32
    %c0_i32_1 = arith.constant 0 : i32
    return %c0_i32, %c0_i32_0 : i32, i32
  }
  func.func @transform_2(%arg0: i32) -> (i32, i32) {
    %c0_i32 = arith.constant 0 : i32
    %c0_i32_0 = arith.constant 0 : i32
    %c0_i32_1 = arith.constant 0 : i32
    return %c0_i32, %c0_i32_0 : i32, i32
  }
  func.func @transform_3(%arg0: i32) -> (i32, i32) {
    %c0_i32 = arith.constant 0 : i32
    %c0_i32_0 = arith.constant 0 : i32
    %c0_i32_1 = arith.constant 0 : i32
    return %c0_i32, %c0_i32_0 : i32, i32
  }
  func.func @transform_4(%arg0: i32) -> (i32, i32) {
    %c0_i32 = arith.constant 0 : i32
    %c0_i32_0 = arith.constant 0 : i32
    %c0_i32_1 = arith.constant 0 : i32
    return %c0_i32, %c0_i32_0 : i32, i32
  }
  func.func @transform_5(%arg0: i32) -> (i32, i32) {
    %c0_i32 = arith.constant 0 : i32
    %c0_i32_0 = arith.constant 0 : i32
    return %arg0, %c0_i32 : i32, i32
  }
}

</mosaic_0001>

<bundles_post_ra>
// kernel: tpu_custom_call.1
= control target key start
LH: loop header
LB: loop body
LE: loop exit
PB: predicated region body
PF: predicated region fallthrough
CT: control target
= control target key end

     0   :  { %vm108_vm0 = vcmask 523264   ;;  %s3079_s1 = inlined_call_operand.vmem [shape: bf16[64,64], index: 1, kind: input, shape index: {}]   ;;  %s3080_s0 = inlined_call_operand.vmem [shape: f32[256,64], index: 0, kind: input, shape index: {}]   ;;  %s3081_s3 = inlined_call_operand.vmem [shape: bf16[64,33], index: 3, kind: input, shape index: {}]   ;;  %s3082_s2 = inlined_call_operand.vmem [shape: f32[1,64], index: 2, kind: input, shape index: {}]   ;;  %s3083_s4 = inlined_call_operand.vmem [shape: f32[1,33], index: 4, kind: input, shape index: {}]   ;;  %s3084_s5 = inlined_call_operand.vmem [shape: f32[256,33], index: 5, kind: output, shape index: {}]  }
   0x1   :  { %v1616_v0 = vld [vmem:[%s3079_s1] sm:$0xff]   ;;  %v1617_v1 = vld [vmem:[%s3079_s1 + $0x8] sm:$0xff]   ;;  %v1618_v2 = vld [vmem:[%s3079_s1 + $0x10] sm:$0xff]  }
   0x2   :  { %1536 = vmatprep.subr.bf16.mxu0 %v1616_v0  ;;  %v21_v3 = vld [vmem:[%s3080_s0] sm:$0xff]  ;;  %v22_v4 = vld [vmem:[%s3080_s0 + $0x8] sm:$0xff]  ;;  %v1619_v6 = vld [vmem:[%s3079_s1 + $0x18] sm:$0xff]  }
   0x3   :  { %1537 = vmatpush3.bf16.msra.mxu0 %v1616_v0  ;;  %v53_v5 = vpack.c.bf16 %v22_v4, %v21_v3  ;;  %v23_v7 = vld [vmem:[%s3080_s0 + $0x10] sm:$0xff]  ;;  %v24_v8 = vld [vmem:[%s3080_s0 + $0x18] sm:$0xff]  ;;  %v25_v9 = vld [vmem:[%s3080_s0 + $0x20] sm:$0xff] }
   0x4   :  { %1538 = vmatprep.subr.bf16.mxu0 %v1617_v1  ;;  %v26_v10 = vld [vmem:[%s3080_s0 + $0x28] sm:$0xff]  ;;  %v54_v11 = vpack.c.bf16 %v24_v8, %v23_v7  ;;  %v27_v13 = vld [vmem:[%s3080_s0 + $0x30] sm:$0xff]  ;;  %v28_v14 = vld [vmem:[%s3080_s0 + $0x38] sm:$0xff] }
   0x5   :  { %1544 = vmatprep.mubr.msk.bf16.mxu0 %vm108_vm0, %v53_v5  ;;  %v55_v12 = vpack.c.bf16 %v26_v10, %v25_v9  ;;  %v29_v15 = vld [vmem:[%s3080_s0 + $0x40] sm:$0xff]  ;;  %v30_v16 = vld [vmem:[%s3080_s0 + $0x48] sm:$0xff]  ;;  %v56_v17 = vpack.c.bf16 %v28_v14, %v27_v13  ;;  %v31_v19 = vld [vmem:[%s3080_s0 + $0x50] sm:$0xff] }
   0x6   :  { %v57_v18 = vpack.c.bf16 %v30_v16, %v29_v15  ;;  %v32_v20 = vld [vmem:[%s3080_s0 + $0x58] sm:$0xff]  ;;  %v33_v21 = vld [vmem:[%s3080_s0 + $0x60] sm:$0xff]  ;;  %v34_v22 = vld [vmem:[%s3080_s0 + $0x68] sm:$0xff] }
   0x7   :  { %1539 = vmatpush3.bf16.msra.mxu0 %v1617_v1  ;;  %v58_v23 = vpack.c.bf16 %v32_v20, %v31_v19  ;;  %v59_v24 = vpack.c.bf16 %v34_v22, %v33_v21  ;;  %v35_v25 = vld [vmem:[%s3080_s0 + $0x70] sm:$0xff]  ;;  %v36_v26 = vld [vmem:[%s3080_s0 + $0x78] sm:$0xff]  ;;  %v37_v27 = vld [vmem:[%s3080_s0 + $0x80] sm:$0xff] }
   0x8   :  { %1540 = vmatprep.subr.bf16.mxu0 %v1618_v2  ;;  %v38_v28 = vld [vmem:[%s3080_s0 + $0x88] sm:$0xff]  ;;  %v60_v29 = vpack.c.bf16 %v36_v26, %v35_v25  ;;  %v39_v31 = vld [vmem:[%s3080_s0 + $0x90] sm:$0xff]  ;;  %v40_v32 = vld [vmem:[%s3080_s0 + $0x98] sm:$0xff] }
   0x9   :  { %v61_v30 = vpack.c.bf16 %v38_v28, %v37_v27  ;;  %v41_v33 = vld [vmem:[%s3080_s0 + $0xa0] sm:$0xff]  ;;  %v42_v34 = vld [vmem:[%s3080_s0 + $0xa8] sm:$0xff]  ;;  %v62_v35 = vpack.c.bf16 %v40_v32, %v39_v31  ;;  %v43_v37 = vld [vmem:[%s3080_s0 + $0xb0] sm:$0xff] }
   0xa   :  { %v63_v36 = vpack.c.bf16 %v42_v34, %v41_v33  ;;  %v44_v38 = vld [vmem:[%s3080_s0 + $0xb8] sm:$0xff]  ;;  %v45_v39 = vld [vmem:[%s3080_s0 + $0xc0] sm:$0xff]  ;;  %v46_v40 = vld [vmem:[%s3080_s0 + $0xc8] sm:$0xff] }
   0xb   :  { %1541 = vmatpush3.bf16.msra.mxu0 %v1618_v2  ;;  %v64_v41 = vpack.c.bf16 %v44_v38, %v43_v37  ;;  %v65_v42 = vpack.c.bf16 %v46_v40, %v45_v39  ;;  %v47_v43 = vld [vmem:[%s3080_s0 + $0xd0] sm:$0xff]  ;;  %v48_v44 = vld [vmem:[%s3080_s0 + $0xd8] sm:$0xff]  ;;  %v49_v45 = vld [vmem:[%s3080_s0 + $0xe0] sm:$0xff] }
   0xc   :  { %1542 = vmatprep.subr.bf16.mxu0 %v1619_v6  ;;  %v50_v46 = vld [vmem:[%s3080_s0 + $0xe8] sm:$0xff]  ;;  %v66_v47 = vpack.c.bf16 %v48_v44, %v47_v43  ;;  %v51_v49 = vld [vmem:[%s3080_s0 + $0xf0] sm:$0xff]  ;;  %v52_v50 = vld [vmem:[%s3080_s0 + $0xf8] sm:$0xff] }
   0xd   :  { %v67_v48 = vpack.c.bf16 %v50_v46, %v49_v45  ;;  %v68_v51 = vpack.c.bf16 %v52_v50, %v51_v49  ;;  %v1620_v52 = vld [vmem:[%s3081_s3] sm:$0xff]   ;;  %v1621_v53 = vld [vmem:[%s3081_s3 + $0x8] sm:$0xff]   ;;  %v1622_v54 = vld [vmem:[%s3081_s3 + $0x10] sm:$0xff]  }
   0xe   :  { %1576 = vmatprep.subr.bf16.mxu1 %v1620_v52  ;;  %v1623_v55 = vld [vmem:[%s3081_s3 + $0x18] sm:$0xff]   ;;  %v2049_v56 = vld [vmem:[%s3082_s2] ss:$0 sm:$0xff] }
   0xf   :  { %1543 = vmatpush3.bf16.msra.mxu0 %v1619_v6  ;;  %1577 = vmatpush3.bf16.msra.mxu1 %v1620_v52 }
  0x10   :  { %1578 = vmatprep.subr.bf16.mxu1 %v1621_v53 }
  0x12   :  { %1545 = vmatmul.mubr.msk.bf16.vlgmr.msra.gmra.mrb[0].mxu0 %vm108_vm0, %v54_v11 }
  0x13   :  { %1548 = vmatprep.mubr.msk.bf16.mxu0 %vm108_vm0, %v55_v12  ;;  %1579 = vmatpush3.bf16.msra.mxu1 %v1621_v53 }
  0x14   :  { %1580 = vmatprep.subr.bf16.mxu1 %v1622_v54 }
  0x17   :  { %1581 = vmatpush3.bf16.msra.mxu1 %v1622_v54 }
  0x18   :  { %1582 = vmatprep.subr.bf16.mxu1 %v1623_v55 }
  0x1a   :  { %1549 = vmatmul.mubr.msk.bf16.gmra.mrb[4].mxu0 %vm108_vm0, %v56_v17 }
  0x1b   :  { %1552 = vmatprep.mubr.msk.bf16.mxu0 %vm108_vm0, %v57_v18  ;;  %1583 = vmatpush3.bf16.msra.mxu1 %v1623_v55 }
  0x22   :  { %1553 = vmatmul.mubr.msk.bf16.gmra.mrb[8].mxu0 %vm108_vm0, %v58_v23 }
  0x23   :  { %1556 = vmatprep.mubr.msk.bf16.mxu0 %vm108_vm0, %v59_v24 }
  0x2a   :  { %1557 = vmatmul.mubr.msk.bf16.gmra.mrb[12].mxu0 %vm108_vm0, %v60_v29 }
  0x2b   :  { %1560 = vmatprep.mubr.msk.bf16.mxu0 %vm108_vm0, %v61_v30 }
  0x32   :  { %1561 = vmatmul.mubr.msk.bf16.gmra.mrb[16].mxu0 %vm108_vm0, %v62_v35 }
  0x33   :  { %1564 = vmatprep.mubr.msk.bf16.mxu0 %vm108_vm0, %v63_v36 }
  0x3a   :  { %1565 = vmatmul.mubr.msk.bf16.gmra.mrb[20].mxu0 %vm108_vm0, %v64_v41 }
  0x3b   :  { %1568 = vmatprep.mubr.msk.bf16.mxu0 %vm108_vm0, %v65_v42 }
  0x42   :  { %1569 = vmatmul.mubr.msk.bf16.gmra.mrb[24].mxu0 %vm108_vm0, %v66_v47 }
  0x43   :  { %1572 = vmatprep.mubr.msk.bf16.mxu0 %vm108_vm0, %v67_v48 }
  0x4a   :  { %1573 = vmatmul.mubr.msk.bf16.gmra.mrb[28].mxu0 %vm108_vm0, %v68_v51 }
  0xe5   :  { %v1546_v57 = vpop.f32.mrb[0].mxu0 }
  0xe6   :  { %v2052_v58 = vadd.f32 %v1546_v57, %v2049_v56  ;;  %v191_v59 = vpop.f32.mrb[1].mxu0 }
  0xe7   :  { %v1547_v60 = vpop.f32.mrb[2].mxu0  ;;  %v2060_v3 = vadd.f32 %v2049_v56, %v191_v59 }
  0xe8   :  { %v352_v61 = vand.u32 2147483647, %v2052_v58  ;;  %v2056_v62 = vadd.f32 %v1547_v60, %v2049_v56  ;;  %v194_v63 = vpop.f32.mrb[3].mxu0  ;;  %v320_v45 = vmax.f32 %v2052_v58, 0.0 }
  0xe9   :  { %v2066_v9 = vadd.f32 %v2049_v56, %v194_v63  ;;  %v350_v12 = vand.u32 2147483647, %v2060_v3 }
  0xea   :  { %v384_v0 = vsub.f32 0.0, %v352_v61  ;;  %v353_v1 = vand.u32 2147483647, %v2056_v62  ;;  %v321_v52 = vmax.f32 %v2056_v62, 0.0 }
  0xeb   :  { %v351_v20 = vand.u32 2147483647, %v2066_v9  ;;  %v382_v23 = vsub.f32 0.0, %v350_v12 }
  0xec   :  { %v418_v2 = vmul.f32 1.442695, %v384_v0  ;;  %v385_v4 = vsub.f32 0.0, %v353_v1 }
  0xed   :  { %v1550_v5 = vpop.f32.mrb[4].mxu0  ;;  %v383_v32 = vsub.f32 0.0, %v351_v20  ;;  %v414_v37 = vmul.f32 1.442695, %v382_v23 }
  0xee   :  { %1624 = vpow2.f32 %v418_v2  ;;  %v420_v6 = vmul.f32 1.442695, %v385_v4  ;;  %v2063_v7 = vadd.f32 %v1550_v5, %v2049_v56  ;;  %v207_v8 = vpop.f32.mrb[5].mxu0 }
  0xef   :  { %v2069_v10 = vadd.f32 %v2049_v56, %v207_v8  ;;  %v1551_v11 = vpop.f32.mrb[6].mxu0  ;;  %v416_v47 = vmul.f32 1.442695, %v383_v32 }
  0xf0   :  { %1626 = vpow2.f32 %v420_v6  ;;  %v356_v13 = vand.u32 2147483647, %v2063_v7  ;;  %v2074_v14 = vadd.f32 %v1551_v11, %v2049_v56  ;;  %v210_v15 = vpop.f32.mrb[7].mxu0  ;;  %v324_v0 = vmax.f32 %v2063_v7, 0.0 }
  0xf1   :  { %v354_v16 = vand.u32 2147483647, %v2069_v10  ;;  %v2078_v17 = vadd.f32 %v2049_v56, %v210_v15 }
  0xf2   :  { %v388_v18 = vsub.f32 0.0, %v356_v13  ;;  %v357_v19 = vand.u32 2147483647, %v2074_v14  ;;  %v322_v13 = vmax.f32 %v2069_v10, 0.0  ;;  %v325_v15 = vmax.f32 %v2074_v14, 0.0 }
  0xf3   :  { %v386_v21 = vsub.f32 0.0, %v354_v16  ;;  %v355_v22 = vand.u32 2147483647, %v2078_v17  ;;  %v323_v16 = vmax.f32 %v2078_v17, 0.0 }
  0xf4   :  { %v426_v24 = vmul.f32 1.442695, %v388_v18  ;;  %v389_v25 = vsub.f32 0.0, %v357_v19 }
  0xf5   :  { %v422_v26 = vmul.f32 1.442695, %v386_v21  ;;  %v387_v27 = vsub.f32 0.0, %v355_v22  ;;  %v1554_v28 = vpop.f32.mrb[8].mxu0 }
  0xf6   :  { %1628 = vpow2.f32 %v426_v24  ;;  %v428_v29 = vmul.f32 1.442695, %v389_v25  ;;  %v2084_v30 = vadd.f32 %v1554_v28, %v2049_v56  ;;  %v223_v31 = vpop.f32.mrb[9].mxu0 }
  0xf7   :  { %1630 = vpow2.f32 %v422_v26  ;;  %v424_v33 = vmul.f32 1.442695, %v387_v27  ;;  %v2087_v34 = vadd.f32 %v2049_v56, %v223_v31  ;;  %v1555_v35 = vpop.f32.mrb[10].mxu0 }
  0xf8   :  { %v1625_v36 = vpop.eup %1624  ;;  %1632 = vpow2.f32 %v428_v29  ;;  %v360_v38 = vand.u32 2147483647, %v2084_v30  ;;  %v226_v39 = vpop.f32.mrb[11].mxu0  ;;  %v2094_v44 = vadd.f32 %v1555_v35, %v2049_v56  ;;  %v328_v20 = vmax.f32 %v2084_v30, 0.0 }
  0xf9   :  { %v496_v40 = vadd.f32 1.0, %v1625_v36  ;;  %1634 = vpow2.f32 %v424_v33  ;;  %v358_v43 = vand.u32 2147483647, %v2087_v34  ;;  %v499_v48 = vmul.f32 -0.5, %v1625_v36 }
  0xfa   :  { %v2090_v41 = vpop.eup %1626  ;;  %v392_v42 = vsub.f32 0.0, %v360_v38  ;;  %v2101_v53 = vadd.f32 %v2049_v56, %v226_v39  ;;  %v361_v59 = vand.u32 2147483647, %v2094_v44  ;;  %v502_v61 = vand.u32 2147483647, %v1625_v36 }
  0xfb   :  { %1636 = vlog2.f32 %v496_v40  ;;  %v505_v46 = vadd.f32 1.0, %v2090_v41  ;;  %v390_v50 = vsub.f32 0.0, %v358_v43  ;;  %v508_v63 = vmul.f32 -0.5, %v2090_v41 }
  0xfc   :  { %1638 = vpow2.f32 %v414_v37  ;;  %v434_v49 = vmul.f32 1.442695, %v392_v42  ;;  %v500_v4 = vadd.f32 1.0, %v499_v48  ;;  %v511_v5 = vand.u32 2147483647, %v2090_v41 }
  0xfd   :  { %1640 = vlog2.f32 %v505_v46  ;;  %v1558_v54 = vpop.f32.mrb[12].mxu0  ;;  %v430_v57 = vmul.f32 1.442695, %v390_v50  ;;  %v359_v6 = vand.u32 2147483647, %v2101_v53  ;;  %v326_v21 = vmax.f32 %v2087_v34, 0.0 }
  0xfe   :  { %1642 = vpow2.f32 %v434_v49  ;;  %v239_v60 = vpop.f32.mrb[13].mxu0  ;;  %v393_v22 = vsub.f32 0.0, %v361_v59  ;;  %vm2128_vm1 = vcmp.lt.f32.partialorder %v502_v61, 0.0004427343  ;;  %v509_v25 = vadd.f32 1.0, %v508_v63 }
  0xff   :  { %1644 = vpow2.f32 %v416_v47  ;;  %v2107_v1 = vpop.f32.mrb[14].mxu0  ;;  %v501_v27 = vmul.f32 %v1625_v36, %v500_v4  ;;  %vm2133_vm2 = vcmp.lt.f32.partialorder %v511_v5, 0.0004427343  ;;  %v391_v29 = vsub.f32 0.0, %v359_v6 }
 0x100   :  { %v2109_v2 = vpop.eup %1628  ;;  %1646 = vpow2.f32 %v430_v57  ;;  %v2113_v8 = vpop.f32.mrb[15].mxu0  ;;  %v436_v40 = vmul.f32 1.442695, %v393_v22  ;;  %v2146_v42 = vadd.f32 %v1558_v54, %v2049_v56  ;;  %v510_v47 = vmul.f32 %v2090_v41, %v509_v25 }
 0x101   :  { %v2115_v11 = vpop.eup %1630  ;;  %v532_v12 = vadd.f32 1.0, %v2109_v2  ;;  %v535_v32 = vmul.f32 -0.5, %v2109_v2  ;;  %v538_v48 = vand.u32 2147483647, %v2109_v2  ;;  %v432_v61 = vmul.f32 1.442695, %v391_v29 }
 0x102   :  { %v2121_v18 = vpop.eup %1632  ;;  %v514_v19 = vadd.f32 1.0, %v2115_v11  ;;  %v517_v33 = vmul.f32 -0.5, %v2115_v11  ;;  %v520_v49 = vand.u32 2147483647, %v2115_v11  ;;  %v2158_v54 = vadd.f32 %v2049_v56, %v239_v60 }
 0x103   :  { %v2126_v23 = vpop.eup %1634  ;;  %1648 = vlog2.f32 %v532_v12  ;;  %v541_v26 = vadd.f32 1.0, %v2121_v18  ;;  %v544_v36 = vmul.f32 -0.5, %v2121_v18  ;;  %v536_v41 = vadd.f32 1.0, %v535_v32 }
 0x104   :  { %1650 = vlog2.f32 %v514_v19  ;;  %v523_v35 = vadd.f32 1.0, %v2126_v23  ;;  %v518_v5 = vadd.f32 1.0, %v517_v33  ;;  %v547_v6 = vand.u32 2147483647, %v2121_v18 }
 0x105   :  { %v1637_v31 = vpop.eup %1636  ;;  %1652 = vlog2.f32 %v541_v26  ;;  %v2140_v37 = vpop.f32.mrb[16].mxu0  ;;  %v526_v12 = vmul.f32 -0.5, %v2126_v23  ;;  %v545_v25 = vadd.f32 1.0, %v544_v36  ;;  %v529_v60 = vand.u32 2147483647, %v2126_v23 }
 0x106   :  { %v2142_v38 = vpop.eup %1638  ;;  %v498_v39 = vmul.f32 0.6931472, %v1637_v31  ;;  %v2148_v43 = vpop.f32.mrb[17].mxu0  ;;  %1654 = vlog2.f32 %v523_v35  ;;  %v2184_v31 = vadd.f32 %v2107_v1, %v2049_v56  ;;  %vm2186_vm3 = vcmp.lt.f32.partialorder %v538_v48, 0.0004427343 }
 0x107   :  { %v1641_v46 = vpop.eup %1640  ;;  %v2160_v63 = vpop.f32.mrb[18].mxu0  ;;  %1656 = vpow2.f32 %v436_v40  ;;  %vm2190_vm4 = vcmp.lt.f32.partialorder %v520_v49, 0.0004427343  ;;  %v519_v1 = vmul.f32 %v2115_v11, %v518_v5  ;;  %v527_v33 = vadd.f32 1.0, %v526_v12 }
 0x108   :  { %v2153_v50 = vpop.eup %1642  ;;  %v504_v57 = vsel %vm2128_vm1, %v501_v27, %v498_v39  ;;  %v507_v59 = vmul.f32 0.6931472, %v1641_v46  ;;  %v2166_v19 = vpop.f32.mrb[19].mxu0  ;;  %1658 = vpow2.f32 %v432_v61  ;;  %v546_v40 = vmul.f32 %v2121_v18, %v545_v25 }
 0x109   :  { %v2162_v4 = vpop.eup %1644  ;;  %v2175_v26 = vadd.f32 %v504_v57, %v320_v45  ;;  %v568_v29 = vadd.f32 1.0, %v2153_v50  ;;  %vm2202_vm5 = vcmp.lt.f32.partialorder %v547_v6, 0.0004427343  ;;  %vm2206_vm6 = vcmp.lt.f32.partialorder %v529_v60, 0.0004427343 }
 0x10a   :  { %v2168_v22 = vpop.eup %1646  ;;  %v513_v24 = vsel %vm2133_vm2, %v510_v47, %v507_v59  ;;  %v362_v11 = vand.u32 2147483647, %v2158_v54  ;;  %v571_v18 = vmul.f32 -0.5, %v2153_v50  ;;  %v528_v6 = vmul.f32 %v2126_v23, %v527_v33 }
 0x10b   :  { %v2179_v27 = vadd.f32 %v513_v24, %v321_v52  ;;  %v550_v58 = vadd.f32 1.0, %v2168_v22  ;;  %v537_v52 = vmul.f32 %v2109_v2, %v536_v41  ;;  %1660 = vlog2.f32 %v568_v29 }
 0x10c   :  { %v364_v2 = vand.u32 2147483647, %v2146_v42  ;;  %v2222_v24 = vadd.f32 %v2049_v56, %v2113_v8  ;;  %v394_v28 = vsub.f32 0.0, %v362_v11  ;;  %v574_v8 = vand.u32 2147483647, %v2153_v50 }
 0x10d   :  { %v1649_v62 = vpop.eup %1648  ;;  %v2199_v35 = vpop.f32.mrb[20].mxu0  ;;  %1662 = vlog2.f32 %v550_v58  ;;  %v365_v58 = vand.u32 2147483647, %v2184_v31 }
 0x10e   :  { %v1651_v39 = vpop.eup %1650  ;;  %v534_v36 = vmul.f32 0.6931472, %v1649_v62  ;;  %v2215_v61 = vpop.f32.mrb[21].mxu0  ;;  %v396_v12 = vsub.f32 0.0, %v364_v2  ;;  %v363_v10 = vand.u32 2147483647, %v2222_v24 }
 0x10f   :  { %v1653_v48 = vpop.eup %1652  ;;  %v516_v49 = vmul.f32 0.6931472, %v1651_v39  ;;  %v2224_v25 = vpop.f32.mrb[22].mxu0  ;;  %v572_v39 = vadd.f32 1.0, %v571_v18  ;;  %vm2267_vm7 = vcmp.lt.f32.partialorder %v574_v8, 0.0004427343  ;;  %v2275_v18 = vadd.f32 %v2140_v37, %v2049_v56 }
 0x110   :  { %v540_v57 = vsel %vm2186_vm3, %v537_v52, %v534_v36  ;;  %v543_v59 = vmul.f32 0.6931472, %v1653_v48  ;;  %v1655_v41 = vpop.eup %1654  ;;  %v2229_v62 = vpop.f32.mrb[23].mxu0  ;;  %v442_v52 = vmul.f32 1.442695, %v396_v12  ;;  %v553_v36 = vmul.f32 -0.5, %v2168_v22 }
 0x111   :  { %v522_v5 = vsel %vm2190_vm4, %v519_v1, %v516_v49  ;;  %v525_v29 = vmul.f32 0.6931472, %v1655_v41  ;;  %v2233_v32 = vadd.f32 %v540_v57, %v324_v0  ;;  %v2240_v1 = vpop.eup %1656  ;;  %v556_v48 = vand.u32 2147483647, %v2168_v22 }
 0x112   :  { %v549_v60 = vsel %vm2202_vm5, %v546_v40, %v543_v59  ;;  %v397_v40 = vsub.f32 0.0, %v365_v58  ;;  %v2247_v7 = vadd.f32 %v522_v5, %v322_v13  ;;  %v2258_v47 = vpop.eup %1658  ;;  %1664 = vpow2.f32 %v442_v52 }
 0x113   :  { %v2237_v23 = vadd.f32 %v549_v60, %v325_v15  ;;  %v531_v33 = vsel %vm2206_vm6, %v528_v6, %v525_v29  ;;  %v577_v15 = vadd.f32 1.0, %v2240_v1  ;;  %v438_v49 = vmul.f32 1.442695, %v394_v28 }
 0x114   :  { %v2253_v0 = vadd.f32 %v531_v33, %v323_v16  ;;  %v559_v17 = vadd.f32 1.0, %v2258_v47  ;;  %v444_v16 = vmul.f32 1.442695, %v397_v40  ;;  %v329_v57 = vmax.f32 %v2094_v44, 0.0 }
 0x115   :  { %v2256_v46 = vpop.f32.mrb[24].mxu0  ;;  %1666 = vlog2.f32 %v577_v15  ;;  %v327_v59 = vmax.f32 %v2101_v53, 0.0  ;;  %v1661_v5 = vpop.eup %1660  ;;  %v573_v6 = vmul.f32 %v2153_v50, %v572_v39  ;;  %v580_v12 = vmul.f32 -0.5, %v2240_v1 }
 0x116   :  { %v2265_v2 = vpop.f32.mrb[25].mxu0  ;;  %1668 = vlog2.f32 %v559_v17  ;;  %v332_v60 = vmax.f32 %v2146_v42, 0.0  ;;  %v554_v58 = vadd.f32 1.0, %v553_v36  ;;  %vm2284_vm8 = vcmp.lt.f32.partialorder %v556_v48, 0.0004427343 }
 0x117   :  { %v2277_v41 = vpop.f32.mrb[26].mxu0  ;;  %v1663_v28 = vpop.eup %1662  ;;  %1670 = vpow2.f32 %v438_v49  ;;  %v395_v37 = vsub.f32 0.0, %v363_v10  ;;  %v583_v52 = vand.u32 2147483647, %v2240_v1  ;;  %v562_v33 = vmul.f32 -0.5, %v2258_v47 }
 0x118   :  { %v2282_v29 = vpop.f32.mrb[27].mxu0  ;;  %1672 = vpow2.f32 %v444_v16  ;;  %v570_v39 = vmul.f32 0.6931472, %v1661_v5  ;;  %v368_v15 = vand.u32 2147483647, %v2275_v18  ;;  %v2294_v36 = vadd.f32 %v2049_v56, %v2148_v43 }
 0x119   :  { %v440_v40 = vmul.f32 1.442695, %v395_v37  ;;  %v552_v48 = vmul.f32 0.6931472, %v1663_v28  ;;  %v581_v17 = vadd.f32 1.0, %v580_v12  ;;  %v2298_v49 = vadd.f32 %v2160_v63, %v2049_v56 }
 0x11a   :  { %v2302_v10 = vadd.f32 %v2049_v56, %v2166_v19  ;;  %v555_v16 = vmul.f32 %v2168_v22, %v554_v58  ;;  %v400_v5 = vsub.f32 0.0, %v368_v15  ;;  %v366_v37 = vand.u32 2147483647, %v2294_v36 }
 0x11b   :  { %1674 = vpow2.f32 %v440_v40  ;;  %vm2310_vm9 = vcmp.lt.f32.partialorder %v583_v52, 0.0004427343  ;;  %v563_v63 = vadd.f32 1.0, %v562_v33  ;;  %v369_v19 = vand.u32 2147483647, %v2298_v49 }
 0x11c   :  { %v2316_v13 = vpop.eup %1664  ;;  %v576_v22 = vsel %vm2267_vm7, %v573_v6, %v570_v39  ;;  %v450_v58 = vmul.f32 1.442695, %v400_v5  ;;  %v398_v40 = vsub.f32 0.0, %v366_v37  ;;  %v367_v15 = vand.u32 2147483647, %v2302_v10 }
 0x11d   :  { %v2304_v14 = vpop.f32.mrb[28].mxu0  ;;  %v558_v52 = vsel %vm2284_vm8, %v555_v16, %v552_v48  ;;  %v582_v55 = vmul.f32 %v2240_v1, %v581_v17  ;;  %v565_v33 = vand.u32 2147483647, %v2258_v47  ;;  %v604_v51 = vadd.f32 1.0, %v2316_v13 }
 0x11e   :  { %v2308_v43 = vpop.f32.mrb[29].mxu0  ;;  %1676 = vpow2.f32 %v450_v58  ;;  %v446_v11 = vmul.f32 1.442695, %v398_v40  ;;  %v401_v6 = vsub.f32 0.0, %v369_v19  ;;  %v564_v37 = vmul.f32 %v2258_v47, %v563_v63 }
 0x11f   :  { %v1667_v45 = vpop.eup %1666  ;;  %v2326_v50 = vpop.f32.mrb[30].mxu0  ;;  %1678 = vlog2.f32 %v604_v51  ;;  %v607_v8 = vmul.f32 -0.5, %v2316_v13  ;;  %v2334_v1 = vadd.f32 %v2199_v35, %v2049_v56  ;;  %v399_v16 = vsub.f32 0.0, %v367_v15 }
 0x120   :  { %v579_v28 = vmul.f32 0.6931472, %v1667_v45  ;;  %v2328_v39 = vpop.f32.mrb[31].mxu0  ;;  %v1669_v5 = vpop.eup %1668  ;;  %1680 = vpow2.f32 %v446_v11  ;;  %v2342_v58 = vadd.f32 %v576_v22, %v328_v20  ;;  %vm566_vm10 = vcmp.lt.f32.partialorder %v565_v33, 0.0004427343 }
 0x121   :  { %v2336_v48 = vpop.eup %1670  ;;  %v561_v17 = vmul.f32 0.6931472, %v1669_v5  ;;  %v2351_v47 = vadd.f32 %v558_v52, %v326_v21  ;;  %v452_v63 = vmul.f32 1.442695, %v401_v6  ;;  %v372_v44 = vand.u32 2147483647, %v2334_v1 }
 0x122   :  { %v585_v45 = vsel %vm2310_vm9, %v582_v55, %v579_v28  ;;  %v1673_v19 = vpop.eup %1672  ;;  %v586_v35 = vadd.f32 1.0, %v2336_v48  ;;  %v448_v22 = vmul.f32 1.442695, %v399_v16  ;;  %v2362_v34 = vadd.f32 %v2049_v56, %v2215_v61 }
 0x123   :  { %v2346_v51 = vadd.f32 %v585_v45, %v329_v57  ;;  %v567_v55 = vsel %vm566_vm10, %v564_v37, %v561_v17  ;;  %v613_v12 = vadd.f32 1.0, %v1673_v19  ;;  %v608_v57 = vadd.f32 1.0, %v607_v8 }
 0x124   :  { %v2357_v30 = vadd.f32 %v567_v55, %v327_v59  ;;  %1682 = vlog2.f32 %v586_v35  ;;  %v589_v40 = vmul.f32 -0.5, %v2336_v48  ;;  %v331_v53 = vmax.f32 %v2222_v24, 0.0 }
 0x125   :  { %v1675_v20 = vpop.eup %1674  ;;  %1684 = vlog2.f32 %v613_v12  ;;  %v616_v15 = vmul.f32 -0.5, %v1673_v19  ;;  %v610_v11 = vand.u32 2147483647, %v2316_v13  ;;  %v404_v61 = vsub.f32 0.0, %v372_v44 }
 0x126   :  { %v595_v59 = vadd.f32 1.0, %v1675_v20  ;;  %1686 = vpow2.f32 %v452_v63  ;;  %v598_v6 = vmul.f32 -0.5, %v1675_v20  ;;  %v609_v37 = vmul.f32 %v2316_v13, %v608_v57 }
 0x127   :  { %v592_v8 = vand.u32 2147483647, %v2336_v48  ;;  %v370_v45 = vand.u32 2147483647, %v2362_v34  ;;  %v590_v16 = vadd.f32 1.0, %v589_v40  ;;  %v617_v28 = vadd.f32 1.0, %v616_v15 }
 0x128   :  { %1688 = vlog2.f32 %v595_v59  ;;  %v2371_v5 = vpop.eup %1676  ;;  %v619_v35 = vand.u32 2147483647, %v1673_v19  ;;  %v601_v55 = vand.u32 2147483647, %v1675_v20  ;;  %v458_v44 = vmul.f32 1.442695, %v404_v61 }
 0x129   :  { %1690 = vpow2.f32 %v448_v22  ;;  %v1679_v17 = vpop.eup %1678  ;;  %v640_v12 = vadd.f32 1.0, %v2371_v5  ;;  %v402_v21 = vsub.f32 0.0, %v370_v45  ;;  %v599_v33 = vadd.f32 1.0, %v598_v6 }
 0x12a   :  { %v2377_v63 = vpop.eup %1680  ;;  %v606_v59 = vmul.f32 0.6931472, %v1679_v17  ;;  %v2382_v57 = vadd.f32 %v2224_v25, %v2049_v56  ;;  %vm2384_vm11 = vcmp.lt.f32.partialorder %v610_v11, 0.0004427343  ;;  %vm2392_vm12 = vcmp.lt.f32.partialorder %v592_v8, 0.0004427343 }
 0x12b   :  { %1692 = vlog2.f32 %v640_v12  ;;  %v622_v13 = vadd.f32 1.0, %v2377_v63  ;;  %v454_v25 = vmul.f32 1.442695, %v402_v21  ;;  %v591_v17 = vmul.f32 %v2336_v48, %v590_v16 }
 0x12c   :  { %1694 = vpow2.f32 %v458_v44  ;;  %v612_v6 = vsel %vm2384_vm11, %v609_v37, %v606_v59  ;;  %v618_v12 = vmul.f32 %v1673_v19, %v617_v28  ;;  %vm2397_vm13 = vcmp.lt.f32.partialorder %v619_v35, 0.0004427343 }
 0x12d   :  { %1696 = vlog2.f32 %v622_v13  ;;  %v600_v52 = vmul.f32 %v1675_v20, %v599_v33  ;;  %vm2401_vm14 = vcmp.lt.f32.partialorder %v601_v55, 0.0004427343  ;;  %v373_v37 = vand.u32 2147483647, %v2382_v57 }
 0x12e   :  { %v1683_v15 = vpop.eup %1682  ;;  %v2408_v21 = vadd.f32 %v612_v6, %v332_v60  ;;  %v643_v48 = vmul.f32 -0.5, %v2371_v5  ;;  %v625_v19 = vmul.f32 -0.5, %v2377_v63  ;;  %v2414_v28 = vadd.f32 %v2049_v56, %v2229_v62 }
 0x12f   :  { %v1685_v45 = vpop.eup %1684  ;;  %v588_v11 = vmul.f32 0.6931472, %v1683_v15  ;;  %1698 = vpow2.f32 %v454_v25  ;;  %v478_v35 = vadd.f32 1.0, %v2142_v38  ;;  %v3111_v60 = vmax.f32 %v2184_v31, 0.0 }
 0x130   :  { %v615_v44 = vmul.f32 0.6931472, %v1685_v45  ;;  %v1687_v8 = vpop.eup %1686  ;;  %v405_v15 = vsub.f32 0.0, %v373_v37  ;;  %v646_v62 = vand.u32 2147483647, %v2371_v5  ;;  %v3112_v31 = vmax.f32 %v2158_v54, 0.0 }
 0x131   :  { %v649_v16 = vadd.f32 1.0, %v1687_v8  ;;  %v594_v42 = vsel %vm2392_vm12, %v591_v17, %v588_v11  ;;  %v652_v6 = vmul.f32 -0.5, %v1687_v8  ;;  %v371_v37 = vand.u32 2147483647, %v2414_v28 }
 0x132   :  { %v1689_v20 = vpop.eup %1688  ;;  %v621_v33 = vsel %vm2397_vm13, %v618_v12, %v615_v44  ;;  %v644_v12 = vadd.f32 1.0, %v643_v48  ;;  %v2432_v17 = vadd.f32 %v594_v42, %v3112_v31  ;;  %v628_v22 = vand.u32 2147483647, %v2377_v63 }
 0x133   :  { %v1691_v55 = vpop.eup %1690  ;;  %v2423_v59 = vadd.f32 %v621_v33, %v3111_v60  ;;  %v597_v13 = vmul.f32 0.6931472, %v1689_v20  ;;  %1700 = vlog2.f32 %v649_v16  ;;  %v626_v33 = vadd.f32 1.0, %v625_v19 }
 0x134   :  { %v631_v40 = vadd.f32 1.0, %v1691_v55  ;;  %v634_v61 = vmul.f32 -0.5, %v1691_v55  ;;  %v653_v16 = vadd.f32 1.0, %v652_v6  ;;  %v655_v42 = vand.u32 2147483647, %v1687_v8 }
 0x135   :  { %v603_v45 = vsel %vm2401_vm14, %v600_v52, %v597_v13  ;;  %v1693_v11 = vpop.eup %1692  ;;  %v460_v52 = vmul.f32 1.442695, %v405_v15  ;;  %v637_v13 = vand.u32 2147483647, %v1691_v55  ;;  %v338_v19 = vmax.f32 %v2362_v34, 0.0 }
 0x136   :  { %v2436_v44 = vadd.f32 %v603_v45, %v331_v53  ;;  %1702 = vlog2.f32 %v631_v40  ;;  %v2439_v20 = vpop.eup %1694  ;;  %v642_v53 = vmul.f32 0.6931472, %v1693_v11  ;;  %v635_v60 = vadd.f32 1.0, %v634_v61 }
 0x137   :  { %1704 = vlog2.f32 %v478_v35  ;;  %v1697_v48 = vpop.eup %1696  ;;  %v676_v24 = vadd.f32 1.0, %v2439_v20  ;;  %v340_v40 = vmax.f32 %v2334_v1, 0.0  ;;  %v341_v45 = vmax.f32 %v2382_v57, 0.0 }
 0x138   :  { %1706 = vpow2.f32 %v460_v52  ;;  %v403_v15 = vsub.f32 0.0, %v371_v37  ;;  %v645_v35 = vmul.f32 %v2371_v5, %v644_v12  ;;  %vm2449_vm15 = vcmp.lt.f32.partialorder %v646_v62, 0.0004427343 }
 0x139   :  { %v624_v6 = vmul.f32 0.6931472, %v1697_v48  ;;  %vm2453_vm1 = vcmp.lt.f32.partialorder %v628_v22, 0.0004427343  ;;  %v2457_v61 = vpop.eup %1698  ;;  %v627_v11 = vmul.f32 %v2377_v63, %v626_v33  ;;  %vm2460_vm2 = vcmp.lt.f32.partialorder %v655_v42, 0.0004427343 }
 0x13a   :  { %1708 = vlog2.f32 %v676_v24  ;;  %v456_v37 = vmul.f32 1.442695, %v403_v15  ;;  %v648_v5 = vsel %vm2449_vm15, %v645_v35, %v642_v53  ;;  %v654_v62 = vmul.f32 %v1687_v8, %v653_v16 }
 0x13b   :  { %v636_v12 = vmul.f32 %v1691_v55, %v635_v60  ;;  %vm2466_vm3 = vcmp.lt.f32.partialorder %v637_v13, 0.0004427343  ;;  %v679_v54 = vmul.f32 -0.5, %v2439_v20  ;;  %v481_v63 = vmul.f32 -0.5, %v2142_v38 }
 0x13c   :  { %1710 = vpow2.f32 %v456_v37  ;;  %v487_v33 = vadd.f32 1.0, %v2162_v4  ;;  %v630_v42 = vsel %vm2453_vm1, %v627_v11, %v624_v6  ;;  %v682_v53 = vand.u32 2147483647, %v2439_v20 }
 0x13d   :  { %v1701_v48 = vpop.eup %1700  ;;  %v658_v8 = vadd.f32 1.0, %v2457_v61  ;;  %v3121_v16 = vmax.f32 %v2275_v18, 0.0  ;;  %v661_v13 = vmul.f32 -0.5, %v2457_v61  ;;  %v2484_v15 = vadd.f32 %v2256_v46, %v2049_v56 }
 0x13e   :  { %v651_v24 = vmul.f32 0.6931472, %v1701_v48  ;;  %1712 = vlog2.f32 %v487_v33  ;;  %v484_v6 = vand.u32 2147483647, %v2142_v38  ;;  %v490_v11 = vmul.f32 -0.5, %v2162_v4 }
 0x13f   :  { %v2479_v60 = vadd.f32 %v648_v5, %v3121_v16  ;;  %v3122_v18 = vmax.f32 %v2294_v36, 0.0  ;;  %v3123_v5 = vmax.f32 %v2298_v49, 0.0  ;;  %v680_v33 = vadd.f32 1.0, %v679_v54 }
 0x140   :  { %v1703_v55 = vpop.eup %1702  ;;  %v657_v25 = vsel %vm2460_vm2, %v654_v62, %v651_v24  ;;  %v482_v46 = vadd.f32 1.0, %v481_v63  ;;  %1714 = vlog2.f32 %v658_v8  ;;  %v376_v62 = vand.u32 2147483647, %v2484_v15 }
 0x141   :  { %v1705_v35 = vpop.eup %1704  ;;  %v633_v31 = vmul.f32 0.6931472, %v1703_v55  ;;  %v2492_v37 = vadd.f32 %v630_v42, %v3122_v18  ;;  %v2496_v48 = vadd.f32 %v657_v25, %v3123_v5  ;;  %v2503_v24 = vadd.f32 %v2049_v56, %v2265_v2 }
 0x142   :  { %v1707_v16 = vpop.eup %1706  ;;  %v3124_v49 = vmax.f32 %v2302_v10, 0.0  ;;  %vm2511_vm4 = vcmp.lt.f32.partialorder %v682_v53, 0.0004427343  ;;  %v662_v63 = vadd.f32 1.0, %v661_v13  ;;  %vm2515_vm5 = vcmp.lt.f32.partialorder %v484_v6, 0.0004427343 }
 0x143   :  { %v639_v52 = vsel %vm2466_vm3, %v636_v12, %v633_v31  ;;  %v685_v22 = vadd.f32 1.0, %v1707_v16  ;;  %v480_v12 = vmul.f32 0.6931472, %v1705_v35  ;;  %v491_v2 = vadd.f32 1.0, %v490_v11 }
 0x144   :  { %v2509_v42 = vadd.f32 %v639_v52, %v3124_v49  ;;  %v408_v55 = vsub.f32 0.0, %v376_v62  ;;  %v1709_v25 = vpop.eup %1708  ;;  %v483_v10 = vmul.f32 %v2142_v38, %v482_v46  ;;  %v493_v53 = vand.u32 2147483647, %v2162_v4 }
 0x145   :  { %1716 = vlog2.f32 %v685_v22  ;;  %v688_v18 = vmul.f32 -0.5, %v1707_v16  ;;  %v339_v5 = vmax.f32 %v2414_v28, 0.0  ;;  %v374_v13 = vand.u32 2147483647, %v2503_v24 }
 0x146   :  { %v466_v35 = vmul.f32 1.442695, %v408_v55  ;;  %v2525_v6 = vpop.eup %1710  ;;  %v681_v11 = vmul.f32 %v2439_v20, %v680_v33  ;;  %v664_v52 = vand.u32 2147483647, %v2457_v61  ;;  %v486_v62 = vsel %vm2515_vm5, %v483_v10, %v480_v12 }
 0x147   :  { %v2533_v38 = vadd.f32 %v2277_v41, %v2049_v56  ;;  %v678_v46 = vmul.f32 0.6931472, %v1709_v25  ;;  %v2536_v49 = vmul.f32 %v2457_v61, %v662_v63  ;;  %v667_v22 = vadd.f32 1.0, %v2525_v6 }
 0x148   :  { %1718 = vpow2.f32 %v466_v35  ;;  %v1713_v55 = vpop.eup %1712  ;;  %v492_v36 = vmul.f32 %v2162_v4, %v491_v2  ;;  %vm2540_vm6 = vcmp.lt.f32.partialorder %v493_v53, 0.0004427343  ;;  %v406_v33 = vsub.f32 0.0, %v374_v13 }
 0x149   :  { %v377_v12 = vand.u32 2147483647, %v2533_v38  ;;  %v689_v8 = vadd.f32 1.0, %v688_v18  ;;  %v691_v41 = vand.u32 2147483647, %v1707_v16  ;;  %1720 = vlog2.f32 %v667_v22 }
 0x14a   :  { %v3131_v25 = vmax.f32 %v2060_v3, 0.0  ;;  %v489_v63 = vmul.f32 0.6931472, %v1713_v55  ;;  %v462_v10 = vmul.f32 1.442695, %v406_v33  ;;  %v2549_v35 = vadd.f32 %v2049_v56, %v2282_v29  ;;  %v1715_v4 = vpop.eup %1714 }
 0x14b   :  { %v409_v31 = vsub.f32 0.0, %v377_v12  ;;  %v684_v2 = vsel %vm2511_vm4, %v681_v11, %v678_v46  ;;  %v670_v53 = vmul.f32 -0.5, %v2525_v6  ;;  %v2556_v18 = vadd.f32 %v2304_v14, %v2049_v56 }
 0x14c   :  { %v766_v61 = vadd.f32 %v486_v62, %v3131_v25  ;;  %v2560_v3 = vadd.f32 %v2049_v56, %v2308_v43  ;;  %v495_v13 = vsel %vm2540_vm6, %v492_v36, %v489_v63  ;;  %1722 = vpow2.f32 %v462_v10 }
 0x14d   :  { %v468_v29 = vmul.f32 1.442695, %v409_v31  ;;  %v2566_v62 = vadd.f32 %v2326_v50, %v2049_v56  ;;  %vm2568_vm7 = vcmp.lt.f32.partialorder %v691_v41, 0.0004427343  ;;  %v3134_v14 = vmax.f32 %v2066_v9, 0.0 }
 0x14e   :  { %v375_v46 = vand.u32 2147483647, %v2549_v35  ;;  %v380_v43 = vand.u32 2147483647, %v2556_v18  ;;  %v660_v55 = vmul.f32 0.6931472, %v1715_v4  ;;  %v690_v36 = vmul.f32 %v1707_v16, %v689_v8 }
 0x14f   :  { %v767_v11 = vadd.f32 %v495_v13, %v3134_v14  ;;  %v1717_v22 = vpop.eup %1716  ;;  %1724 = vpow2.f32 %v468_v29  ;;  %v378_v31 = vand.u32 2147483647, %v2560_v3  ;;  %v671_v41 = vadd.f32 1.0, %v670_v53 }
 0x150   :  { %v687_v20 = vmul.f32 0.6931472, %v1717_v22  ;;  %v407_v33 = vsub.f32 0.0, %v375_v46  ;;  %v412_v12 = vsub.f32 0.0, %v380_v43  ;;  %v673_v25 = vand.u32 2147483647, %v2525_v6 }
 0x151   :  { %v798_v50 = vpack.c.bf16 %v767_v11, %v766_v61  ;;  %v410_v63 = vsub.f32 0.0, %v378_v31  ;;  %v381_v9 = vand.u32 2147483647, %v2566_v62  ;;  %v2586_v61 = vadd.f32 %v2049_v56, %v2328_v39 }
 0x152   :  { %v2579_v10 = vpop.eup %1718  ;;  %v693_v13 = vsel %vm2568_vm7, %v690_v36, %v687_v20  ;;  %v464_v16 = vmul.f32 1.442695, %v407_v33  ;;  %v474_v8 = vmul.f32 1.442695, %v412_v12  ;;  %v2590_v4 = vadd.f32 %v684_v2, %v340_v40 }
 0x153   :  { %1584 = vmatprep.mubr.msk.bf16.mxu1 %vm108_vm0, %v798_v50  ;;  %vm2592_vm8 = vcmp.lt.f32.partialorder %v664_v52, 0.0004427343  ;;  %v2598_v29 = vadd.f32 %v693_v13, %v341_v45  ;;  %v3137_v54 = vpack.c.bf16 %v2179_v27, %v2175_v26  ;;  %v712_v56 = vadd.f32 1.0, %v2579_v10  ;;  %v1721_v39 = vpop.eup %1720 }
 0x154   :  { %v666_v1 = vsel %vm2592_vm8, %v2536_v49, %v660_v55  ;;  %1726 = vpow2.f32 %v464_v16  ;;  %v3138_v40 = vpack.c.bf16 %v2253_v0, %v2247_v7  ;;  %v470_v57 = vmul.f32 1.442695, %v410_v63 }
 0x155   :  { %1585 = vmatmul.mubr.msk.bf16.vlgmr.msra.gmra.mrb[0].mxu1 %vm108_vm0, %v3137_v54  ;;  %v413_v45 = vsub.f32 0.0, %v381_v9  ;;  %v809_v26 = vpack.c.bf16 %v2598_v29, %v2590_v4  ;;  %v669_v27 = vmul.f32 0.6931472, %v1721_v39  ;;  %v672_v52 = vmul.f32 %v2525_v6, %v671_v41 }
 0x156   :  { %1588 = vmatprep.mubr.msk.bf16.mxu1 %vm108_vm0, %v3138_v40  ;;  %1728 = vlog2.f32 %v712_v56  ;;  %vm674_vm9 = vcmp.lt.f32.partialorder %v673_v25, 0.0004427343  ;;  %v379_v49 = vand.u32 2147483647, %v2586_v61  ;;  %v1723_v14 = vpop.eup %1722  ;;  %v2618_v7 = vadd.f32 %v666_v1, %v338_v19 }
 0x157   :  { %1730 = vpow2.f32 %v474_v8  ;;  %v476_v2 = vmul.f32 1.442695, %v413_v45  ;;  %v675_v11 = vsel %vm674_vm9, %v672_v52, %v669_v27  ;;  %v694_v46 = vadd.f32 1.0, %v1723_v14 }
 0x158   :  { %1732 = vpow2.f32 %v470_v57  ;;  %v2622_v0 = vadd.f32 %v675_v11, %v339_v5  ;;  %v411_v6 = vsub.f32 0.0, %v379_v49  ;;  %v3139_v36 = vpack.c.bf16 %v2237_v23, %v2233_v32 }
 0x159   :  { %v1725_v43 = vpop.eup %1724  ;;  %1734 = vpow2.f32 %v476_v2  ;;  %v3140_v28 = vpack.c.bf16 %v2357_v30, %v2351_v47  ;;  %v715_v5 = vmul.f32 -0.5, %v2579_v10  ;;  %v697_v41 = vmul.f32 -0.5, %v1723_v14 }
 0x15a   :  { %v808_v22 = vpack.c.bf16 %v2622_v0, %v2618_v7  ;;  %1736 = vlog2.f32 %v694_v46  ;;  %v721_v55 = vadd.f32 1.0, %v1725_v43  ;;  %v472_v34 = vmul.f32 1.442695, %v411_v6 }
 0x15b   :  { %v724_v20 = vmul.f32 -0.5, %v1725_v43  ;;  %v716_v23 = vadd.f32 1.0, %v715_v5  ;;  %v718_v25 = vand.u32 2147483647, %v2579_v10  ;;  %v3141_v13 = vpack.c.bf16 %v2346_v51, %v2342_v58 }
 0x15c   :  { %1738 = vlog2.f32 %v721_v55  ;;  %v344_v16 = vmax.f32 %v2484_v15, 0.0  ;;  %v3142_v53 = vpack.c.bf16 %v2436_v44, %v2432_v17  ;;  %v342_v56 = vmax.f32 %v2503_v24, 0.0 }
 0x15d   :  { %1589 = vmatmul.mubr.msk.bf16.gmra.mrb[4].mxu1 %vm108_vm0, %v3139_v36  ;;  %1740 = vpow2.f32 %v472_v34  ;;  %v725_v63 = vadd.f32 1.0, %v724_v20  ;;  %v727_v39 = vand.u32 2147483647, %v1725_v43  ;;  %v717_v40 = vmul.f32 %v2579_v10, %v716_v23 }
 0x15e   :  { %1592 = vmatprep.mubr.msk.bf16.mxu1 %vm108_vm0, %v3140_v28  ;;  %v1727_v19 = vpop.eup %1726  ;;  %v698_v58 = vadd.f32 1.0, %v697_v41  ;;  %v700_v51 = vand.u32 2147483647, %v1723_v14  ;;  %v345_v57 = vmax.f32 %v2533_v38, 0.0  ;;  %vm2657_vm10 = vcmp.lt.f32.partialorder %v718_v25, 0.0004427343 }
 0x15f   :  { %v703_v50 = vadd.f32 1.0, %v1727_v19  ;;  %v706_v9 = vmul.f32 -0.5, %v1727_v19  ;;  %v726_v17 = vmul.f32 %v1725_v43, %v725_v63  ;;  %vm728_vm11 = vcmp.lt.f32.partialorder %v727_v39, 0.0004427343 }
 0x160   :  { %v1729_v31 = vpop.eup %1728  ;;  %v709_v49 = vand.u32 2147483647, %v1727_v19  ;;  %v699_v46 = vmul.f32 %v1723_v14, %v698_v58  ;;  %vm2668_vm12 = vcmp.lt.f32.partialorder %v700_v51, 0.0004427343  ;;  %v343_v55 = vmax.f32 %v2549_v35, 0.0 }
 0x161   :  { %v2635_v33 = vpop.eup %1730  ;;  %1742 = vlog2.f32 %v703_v50  ;;  %v714_v8 = vmul.f32 0.6931472, %v1729_v31  ;;  %v707_v44 = vadd.f32 1.0, %v706_v9  ;;  %v3147_v31 = vpack.c.bf16 %v2423_v59, %v2408_v21 }
 0x162   :  { %v2637_v12 = vpop.eup %1732  ;;  %v748_v32 = vadd.f32 1.0, %v2635_v33  ;;  %v751_v10 = vmul.f32 -0.5, %v2635_v33  ;;  %v3148_v35 = vpack.c.bf16 %v2509_v42, %v2492_v37  ;;  %vm710_vm13 = vcmp.lt.f32.partialorder %v709_v49, 0.0004427343 }
 0x163   :  { %v730_v47 = vadd.f32 1.0, %v2637_v12  ;;  %v2641_v30 = vpop.eup %1734  ;;  %v720_v24 = vsel %vm2657_vm10, %v717_v40, %v714_v8  ;;  %v708_v5 = vmul.f32 %v1727_v19, %v707_v44  ;;  %v754_v41 = vand.u32 2147483647, %v2635_v33 }
 0x164   :  { %1744 = vlog2.f32 %v748_v32  ;;  %v1737_v54 = vpop.eup %1736  ;;  %v757_v1 = vadd.f32 1.0, %v2641_v30  ;;  %v760_v38 = vmul.f32 -0.5, %v2641_v30  ;;  %v792_v34 = vadd.f32 %v720_v24, %v344_v16 }
 0x165   :  { %1593 = vmatmul.mubr.msk.bf16.gmra.mrb[8].mxu1 %vm108_vm0, %v3141_v13  ;;  %1746 = vlog2.f32 %v730_v47  ;;  %v696_v52 = vmul.f32 0.6931472, %v1737_v54  ;;  %v752_v50 = vadd.f32 1.0, %v751_v10  ;;  %v733_v32 = vmul.f32 -0.5, %v2637_v12 }
 0x166   :  { %1596 = vmatprep.mubr.msk.bf16.mxu1 %vm108_vm0, %v3142_v53  ;;  %v1739_v15 = vpop.eup %1738  ;;  %1748 = vlog2.f32 %v757_v1  ;;  %v761_v21 = vadd.f32 1.0, %v760_v38  ;;  %v763_v16 = vand.u32 2147483647, %v2641_v30  ;;  %vm2688_vm14 = vcmp.lt.f32.partialorder %v754_v41, 0.0004427343 }
 0x167   :  { %v2661_v27 = vpop.eup %1740  ;;  %v723_v2 = vmul.f32 0.6931472, %v1739_v15  ;;  %v702_v14 = vsel %vm2668_vm12, %v699_v46, %v696_v52  ;;  %v753_v8 = vmul.f32 %v2635_v33, %v752_v50  ;;  %v734_v37 = vadd.f32 1.0, %v733_v32 }
 0x168   :  { %v739_v11 = vadd.f32 1.0, %v2661_v27  ;;  %v742_v25 = vmul.f32 -0.5, %v2661_v27  ;;  %v790_v9 = vadd.f32 %v702_v14, %v342_v56  ;;  %v736_v39 = vand.u32 2147483647, %v2637_v12 }
 0x169   :  { %v729_v6 = vsel %vm728_vm11, %v726_v17, %v723_v2  ;;  %v762_v1 = vmul.f32 %v2641_v30, %v761_v21  ;;  %v349_v33 = vmax.f32 %v2566_v62, 0.0  ;;  %vm764_vm15 = vcmp.lt.f32.partialorder %v763_v16, 0.0004427343 }
 0x16a   :  { %v793_v28 = vadd.f32 %v729_v6, %v345_v57  ;;  %1750 = vlog2.f32 %v739_v11  ;;  %v743_v51 = vadd.f32 1.0, %v742_v25  ;;  %v348_v57 = vmax.f32 %v2556_v18, 0.0 }
 0x16b   :  { %v1743_v36 = vpop.eup %1742  ;;  %v745_v15 = vand.u32 2147483647, %v2661_v27  ;;  %v3151_v45 = vpack.c.bf16 %v2496_v48, %v2479_v60  ;;  %v735_v30 = vmul.f32 %v2637_v12, %v734_v37  ;;  %vm737_vm1 = vcmp.lt.f32.partialorder %v736_v39, 0.0004427343 }
 0x16c   :  { %v705_v20 = vmul.f32 0.6931472, %v1743_v36  ;;  %v811_v19 = vpack.c.bf16 %v793_v28, %v792_v34  ;;  %v744_v2 = vmul.f32 %v2661_v27, %v743_v51  ;;  %v346_v60 = vmax.f32 %v2560_v3, 0.0  ;;  %v2722_v3 = vld [vmem:[%s3083_s4] ss:$0 sm:$0xff] }
 0x16d   :  { %1597 = vmatmul.mubr.msk.bf16.gmra.mrb[12].mxu1 %vm108_vm0, %v3147_v31  ;;  %v347_v10 = vmax.f32 %v2586_v61, 0.0  ;;  %vm746_vm2 = vcmp.lt.f32.partialorder %v745_v15, 0.0004427343  ;;  %v1062_v51 = vlaneseq  ;;  %vm1353_vm3 = vcmask 269312  }
 0x16e   :  { %1600 = vmatprep.mubr.msk.bf16.mxu1 %vm108_vm0, %v3148_v35  ;;  %v1745_v23 = vpop.eup %1744  ;;  %v711_v59 = vsel %vm710_vm13, %v708_v5, %v705_v20 }
 0x16f   :  { %v750_v47 = vmul.f32 0.6931472, %v1745_v23  ;;  %v1747_v63 = vpop.eup %1746  ;;  %v791_v13 = vadd.f32 %v711_v59, %v343_v55 }
 0x170   :  { %v1749_v42 = vpop.eup %1748  ;;  %v732_v56 = vmul.f32 0.6931472, %v1747_v63 }
 0x171   :  { %v810_v53 = vpack.c.bf16 %v791_v13, %v790_v9  ;;  %v756_v40 = vsel %vm2688_vm14, %v753_v8, %v750_v47  ;;  %v759_v58 = vmul.f32 0.6931472, %v1749_v42 }
 0x172   :  { %v796_v18 = vadd.f32 %v756_v40, %v348_v57  ;;  %v738_v24 = vsel %vm737_vm1, %v735_v30, %v732_v56 }
 0x173   :  { %v765_v17 = vsel %vm764_vm15, %v762_v1, %v759_v58  ;;  %v794_v49 = vadd.f32 %v738_v24, %v346_v60 }
 0x174   :  { %v1751_v44 = vpop.eup %1750  ;;  %v797_v62 = vadd.f32 %v765_v17, %v349_v33 }
 0x175   :  { %1601 = vmatmul.mubr.msk.bf16.gmra.mrb[16].mxu1 %vm108_vm0, %v3151_v45  ;;  %v741_v52 = vmul.f32 0.6931472, %v1751_v44 }
 0x176   :  { %1604 = vmatprep.mubr.msk.bf16.mxu1 %vm108_vm0, %v808_v22  ;;  %v813_v48 = vpack.c.bf16 %v797_v62, %v796_v18 }
 0x177   :  { %v747_v12 = vsel %vm746_vm2, %v744_v2, %v741_v52  ;;  %v2775_v52 = vand.u32 127, %v1062_v51 }
 0x178   :  { %v795_v38 = vadd.f32 %v747_v12, %v347_v10 }
 0x17a   :  { %v812_v7 = vpack.c.bf16 %v795_v38, %v794_v49 }
 0x17d   :  { %1605 = vmatmul.mubr.msk.bf16.gmra.mrb[20].mxu1 %vm108_vm0, %v809_v26 }
 0x17e   :  { %1608 = vmatprep.mubr.msk.bf16.mxu1 %vm108_vm0, %v810_v53 }
 0x185   :  { %1609 = vmatmul.mubr.msk.bf16.gmra.mrb[24].mxu1 %vm108_vm0, %v811_v19 }
 0x186   :  { %1612 = vmatprep.mubr.msk.bf16.mxu1 %vm108_vm0, %v812_v7 }
 0x18d   :  { %1613 = vmatmul.mubr.msk.bf16.gmra.mrb[28].mxu1 %vm108_vm0, %v813_v48  ;;  %vm1320_vm0 = vcmp.eq.s32.totalorder %v2775_v52, 0 }
 0x228   :  { %v1586_v61 = vpop.f32.mrb[0].mxu1 }
 0x229   :  { %v2725_v0 = vadd.f32 %v1586_v61, %v2722_v3  ;;  %v935_v4 = vpop.f32.mrb[1].mxu1 }
 0x22a   :  { %v2728_v29 = vadd.f32 %v2722_v3, %v935_v4  ;;  %v1587_v26 = vpop.f32.mrb[2].mxu1 }
 0x22b   :  { %v1434_v22 = vmul.f32 -1.442695, %v2725_v0  ;;  %v2732_v27 = vadd.f32 %v1587_v26, %v2722_v3  ;;  %v938_v11 = vpop.f32.mrb[3].mxu1 }
 0x22c   :  { %v1432_v46 = vmul.f32 -1.442695, %v2728_v29  ;;  %v2736_v43 = vadd.f32 %v2722_v3, %v938_v11 }
 0x22d   :  { %1752 = vpow2.f32 %v1434_v22  ;;  %v1435_v6 = vmul.f32 -1.442695, %v2732_v27 }
 0x22e   :  { %1754 = vpow2.f32 %v1432_v46  ;;  %v1433_v55 = vmul.f32 -1.442695, %v2736_v43 }
 0x22f   :  { %1756 = vpow2.f32 %v1435_v6 }
 0x230   :  { %1758 = vpow2.f32 %v1433_v55  ;;  %v1590_v36 = vpop.f32.mrb[4].mxu1 }
 0x231   :  { %v2741_v34 = vadd.f32 %v1590_v36, %v2722_v3  ;;  %v951_v28 = vpop.f32.mrb[5].mxu1 }
 0x232   :  { %v2744_v5 = vadd.f32 %v2722_v3, %v951_v28  ;;  %v1591_v31 = vpop.f32.mrb[6].mxu1 }
 0x233   :  { %v1438_v14 = vmul.f32 -1.442695, %v2741_v34  ;;  %v2748_v20 = vadd.f32 %v1591_v31, %v2722_v3  ;;  %v954_v50 = vpop.f32.mrb[7].mxu1 }
 0x234   :  { %v1436_v32 = vmul.f32 -1.442695, %v2744_v5  ;;  %v2752_v35 = vadd.f32 %v2722_v3, %v954_v50 }
 0x235   :  { %1760 = vpow2.f32 %v1438_v14  ;;  %v1439_v23 = vmul.f32 -1.442695, %v2748_v20 }
 0x236   :  { %1762 = vpow2.f32 %v1436_v32  ;;  %v1437_v19 = vmul.f32 -1.442695, %v2752_v35 }
 0x237   :  { %v1753_v41 = vpop.eup %1752  ;;  %1764 = vpow2.f32 %v1439_v23 }
 0x238   :  { %v1755_v21 = vpop.eup %1754  ;;  %v1162_v59 = vadd.f32 1.0, %v1753_v41  ;;  %1766 = vpow2.f32 %v1437_v19  ;;  %v1594_v47 = vpop.f32.mrb[8].mxu1 }
 0x239   :  { %v1757_v25 = vpop.eup %1756  ;;  %v1160_v63 = vadd.f32 1.0, %v1755_v21  ;;  %v2757_v9 = vadd.f32 %v1594_v47, %v2722_v3  ;;  %v967_v13 = vpop.f32.mrb[9].mxu1 }
 0x23a   :  { %v1759_v16 = vpop.eup %1758  ;;  %1768 = vrcp.f32 %v1162_v59  ;;  %v1163_v8 = vadd.f32 1.0, %v1757_v25  ;;  %v2760_v37 = vadd.f32 %v2722_v3, %v967_v13  ;;  %v1595_v42 = vpop.f32.mrb[10].mxu1 }
 0x23b   :  { %1770 = vrcp.f32 %v1160_v63  ;;  %v1161_v53 = vadd.f32 1.0, %v1759_v16  ;;  %v1442_v54 = vmul.f32 -1.442695, %v2757_v9  ;;  %v2764_v39 = vadd.f32 %v1595_v42, %v2722_v3  ;;  %v970_v1 = vpop.f32.mrb[11].mxu1 }
 0x23c   :  { %1772 = vrcp.f32 %v1163_v8  ;;  %v1440_v40 = vmul.f32 -1.442695, %v2760_v37  ;;  %v2768_v56 = vadd.f32 %v2722_v3, %v970_v1 }
 0x23d   :  { %1774 = vrcp.f32 %v1161_v53  ;;  %v1443_v58 = vmul.f32 -1.442695, %v2764_v39 }
 0x23e   :  { %1776 = vpow2.f32 %v1442_v54  ;;  %v1441_v57 = vmul.f32 -1.442695, %v2768_v56 }
 0x23f   :  { %v1761_v33 = vpop.eup %1760  ;;  %1778 = vpow2.f32 %v1440_v40 }
 0x240   :  { %v1763_v15 = vpop.eup %1762  ;;  %v1166_v45 = vadd.f32 1.0, %v1761_v33  ;;  %1780 = vpow2.f32 %v1443_v58  ;;  %v1598_v30 = vpop.f32.mrb[12].mxu1 }
 0x241   :  { %v1765_v17 = vpop.eup %1764  ;;  %v1164_v44 = vadd.f32 1.0, %v1763_v15  ;;  %1782 = vpow2.f32 %v1441_v57  ;;  %v2773_v18 = vadd.f32 %v1598_v30, %v2722_v3  ;;  %v983_v62 = vpop.f32.mrb[13].mxu1 }
 0x242   :  { %v1767_v24 = vpop.eup %1766  ;;  %1784 = vrcp.f32 %v1166_v45  ;;  %v1167_v2 = vadd.f32 1.0, %v1765_v17  ;;  %v2778_v60 = vadd.f32 %v2722_v3, %v983_v62  ;;  %v1599_v48 = vpop.f32.mrb[14].mxu1 }
 0x243   :  { %1786 = vrcp.f32 %v1164_v44  ;;  %v1165_v10 = vadd.f32 1.0, %v1767_v24  ;;  %v1446_v12 = vmul.f32 -1.442695, %v2773_v18  ;;  %v2782_v49 = vadd.f32 %v1599_v48, %v2722_v3  ;;  %v986_v38 = vpop.f32.mrb[15].mxu1 }
 0x244   :  { %v1769_v7 = vpop.eup %1768  ;;  %1788 = vrcp.f32 %v1167_v2  ;;  %v1444_v61 = vmul.f32 -1.442695, %v2778_v60  ;;  %v2786_v4 = vadd.f32 %v2722_v3, %v986_v38 }
 0x245   :  { %v1771_v26 = vpop.eup %1770  ;;  %v1258_v22 = vmul.f32 1.002, %v1769_v7  ;;  %1790 = vrcp.f32 %v1165_v10  ;;  %v1447_v11 = vmul.f32 -1.442695, %v2782_v49 }
 0x246   :  { %v1773_v46 = vpop.eup %1772  ;;  %v1256_v6 = vmul.f32 1.002, %v1771_v26  ;;  %1792 = vpow2.f32 %v1446_v12  ;;  %v1445_v55 = vmul.f32 -1.442695, %v2786_v4 }
 0x247   :  { %v1775_v36 = vpop.eup %1774  ;;  %v1466_v28 = vadd.f32 -0.001, %v1258_v22  ;;  %v1259_v31 = vmul.f32 1.002, %v1773_v46  ;;  %1794 = vpow2.f32 %v1444_v61 }
 0x248   :  { %v1777_v14 = vpop.eup %1776  ;;  %v1464_v50 = vadd.f32 -0.001, %v1256_v6  ;;  %v1257_v32 = vmul.f32 1.002, %v1775_v36  ;;  %1796 = vpow2.f32 %v1447_v11  ;;  %v1602_v23 = vpop.f32.mrb[16].mxu1 }
 0x249   :  { %v1779_v19 = vpop.eup %1778  ;;  %v1323_v41 = vsel %vm1320_vm0, %v2725_v0, %v1466_v28  ;;  %v1467_v21 = vadd.f32 -0.001, %v1259_v31  ;;  %v1170_v59 = vadd.f32 1.0, %v1777_v14  ;;  %1798 = vpow2.f32 %v1445_v55  ;;  %v999_v47 = vpop.f32.mrb[17].mxu1 }
 0x24a   :  { %v1781_v25 = vpop.eup %1780  ;;  %1356 = vst.msk [vmem:[%s3084_s5 + $0x10] sm:$0xff] %vm1353_vm3, %v1323_v41  ;;  %v1321_v63 = vsel %vm1320_vm0, %v2728_v29, %v1464_v50  ;;  %v1465_v13 = vadd.f32 -0.001, %v1257_v32  ;;  %v1168_v16 = vadd.f32 1.0, %v1779_v19  ;;  %v2802_v8 = vadd.f32 %v1602_v23, %v2722_v3  ;;  %v1603_v0 = vpop.f32.mrb[18].mxu1 }
 0x24b   :  { %v1783_v42 = vpop.eup %1782  ;;  %1354 = vst.msk [vmem:[%s3084_s5] sm:$0xff] %vm1353_vm3, %v1321_v63  ;;  %v1324_v53 = vsel %vm1320_vm0, %v2732_v27, %v1467_v21  ;;  %1800 = vrcp.f32 %v1170_v59  ;;  %v1171_v54 = vadd.f32 1.0, %v1781_v25  ;;  %v2812_v29 = vadd.f32 %v2722_v3, %v999_v47  ;;  %v1002_v1 = vpop.f32.mrb[19].mxu1 }
 0x24c   :  { %v1785_v40 = vpop.eup %1784  ;;  %1357 = vst.msk [vmem:[%s3084_s5 + $0x18] sm:$0xff] %vm1353_vm3, %v1324_v53  ;;  %v1322_v58 = vsel %vm1320_vm0, %v2736_v43, %v1465_v13  ;;  %1802 = vrcp.f32 %v1168_v16  ;;  %v1169_v51 = vadd.f32 1.0, %v1783_v42  ;;  %v1450_v27 = vmul.f32 -1.442695, %v2802_v8 }
 0x24d   :  { %v1787_v57 = vpop.eup %1786  ;;  %1355 = vst.msk [vmem:[%s3084_s5 + $0x8] sm:$0xff] %vm1353_vm3, %v1322_v58  ;;  %v1262_v33 = vmul.f32 1.002, %v1785_v40  ;;  %1804 = vrcp.f32 %v1171_v54  ;;  %v1448_v15 = vmul.f32 -1.442695, %v2812_v29  ;;  %v2828_v45 = vadd.f32 %v1603_v0, %v2722_v3 }
 0x24e   :  { %v1789_v30 = vpop.eup %1788  ;;  %v1260_v17 = vmul.f32 1.002, %v1787_v57  ;;  %1806 = vrcp.f32 %v1169_v51  ;;  %v2831_v43 = vadd.f32 %v2722_v3, %v1002_v1 }
 0x24f   :  { %v1791_v44 = vpop.eup %1790  ;;  %v1470_v62 = vadd.f32 -0.001, %v1262_v33  ;;  %v1263_v24 = vmul.f32 1.002, %v1789_v30  ;;  %1808 = vpow2.f32 %v1450_v27  ;;  %v1451_v2 = vmul.f32 -1.442695, %v2828_v45 }
 0x250   :  { %v1793_v48 = vpop.eup %1792  ;;  %v1468_v10 = vadd.f32 -0.001, %v1260_v17  ;;  %v1261_v12 = vmul.f32 1.002, %v1791_v44  ;;  %1810 = vpow2.f32 %v1448_v15  ;;  %v1449_v38 = vmul.f32 -1.442695, %v2831_v43 }
 0x251   :  { %v1795_v7 = vpop.eup %1794  ;;  %v1327_v61 = vsel %vm1320_vm0, %v2741_v34, %v1470_v62  ;;  %v1471_v26 = vadd.f32 -0.001, %v1263_v24  ;;  %v1174_v22 = vadd.f32 1.0, %v1793_v48  ;;  %1812 = vpow2.f32 %v1451_v2  ;;  %v1606_v11 = vpop.f32.mrb[20].mxu1 }
 0x252   :  { %v1797_v46 = vpop.eup %1796  ;;  %1360 = vst.msk [vmem:[%s3084_s5 + $0x30] sm:$0xff] %vm1353_vm3, %v1327_v61  ;;  %v1325_v6 = vsel %vm1320_vm0, %v2744_v5, %v1468_v10  ;;  %v1469_v55 = vadd.f32 -0.001, %v1261_v12  ;;  %v1172_v36 = vadd.f32 1.0, %v1795_v7  ;;  %1814 = vpow2.f32 %v1449_v38  ;;  %v1015_v28 = vpop.f32.mrb[21].mxu1 }
 0x253   :  { %v1799_v31 = vpop.eup %1798  ;;  %1358 = vst.msk [vmem:[%s3084_s5 + $0x20] sm:$0xff] %vm1353_vm3, %v1325_v6  ;;  %v1328_v34 = vsel %vm1320_vm0, %v2748_v20, %v1471_v26  ;;  %1816 = vrcp.f32 %v1174_v22  ;;  %v1175_v14 = vadd.f32 1.0, %v1797_v46  ;;  %v2853_v50 = vadd.f32 %v1606_v11, %v2722_v3  ;;  %v1607_v5 = vpop.f32.mrb[22].mxu1 }
 0x254   :  { %1361 = vst.msk [vmem:[%s3084_s5 + $0x38] sm:$0xff] %vm1353_vm3, %v1328_v34  ;;  %v1326_v32 = vsel %vm1320_vm0, %v2752_v35, %v1469_v55  ;;  %1818 = vrcp.f32 %v1172_v36  ;;  %v1173_v23 = vadd.f32 1.0, %v1799_v31  ;;  %v2863_v19 = vadd.f32 %v2722_v3, %v1015_v28  ;;  %v1018_v20 = vpop.f32.mrb[23].mxu1 }
 0x255   :  { %v1801_v41 = vpop.eup %1800  ;;  %1359 = vst.msk [vmem:[%s3084_s5 + $0x28] sm:$0xff] %vm1353_vm3, %v1326_v32  ;;  %1820 = vrcp.f32 %v1175_v14  ;;  %v1454_v21 = vmul.f32 -1.442695, %v2853_v50  ;;  %v2871_v59 = vadd.f32 %v1607_v5, %v2722_v3  ;;  %v2874_v35 = vadd.f32 %v2722_v3, %v1018_v20 }
 0x256   :  { %v1803_v47 = vpop.eup %1802  ;;  %v1266_v25 = vmul.f32 1.002, %v1801_v41  ;;  %1822 = vrcp.f32 %v1173_v23  ;;  %v1452_v63 = vmul.f32 -1.442695, %v2863_v19 }
 0x257   :  { %v1805_v13 = vpop.eup %1804  ;;  %v1264_v16 = vmul.f32 1.002, %v1803_v47  ;;  %1824 = vpow2.f32 %v1454_v21  ;;  %v1455_v0 = vmul.f32 -1.442695, %v2871_v59  ;;  %v1453_v42 = vmul.f32 -1.442695, %v2874_v35 }
 0x258   :  { %v1807_v53 = vpop.eup %1806  ;;  %v1474_v54 = vadd.f32 -0.001, %v1266_v25  ;;  %v1267_v1 = vmul.f32 1.002, %v1805_v13  ;;  %1826 = vpow2.f32 %v1452_v63  ;;  %v1610_v40 = vpop.f32.mrb[24].mxu1 }
 0x259   :  { %v1809_v58 = vpop.eup %1808  ;;  %v1472_v51 = vadd.f32 -0.001, %v1264_v16  ;;  %v1265_v27 = vmul.f32 1.002, %v1807_v53  ;;  %1828 = vpow2.f32 %v1455_v0  ;;  %v2880_v57 = vadd.f32 %v1610_v40, %v2722_v3  ;;  %v1031_v33 = vpop.f32.mrb[25].mxu1 }
 0x25a   :  { %v1811_v15 = vpop.eup %1810  ;;  %v1331_v30 = vsel %vm1320_vm0, %v2757_v9, %v1474_v54  ;;  %v1475_v17 = vadd.f32 -0.001, %v1267_v1  ;;  %v1178_v44 = vadd.f32 1.0, %v1809_v58  ;;  %1830 = vpow2.f32 %v1453_v42  ;;  %v1611_v62 = vpop.f32.mrb[26].mxu1 }
 0x25b   :  { %v1813_v24 = vpop.eup %1812  ;;  %1364 = vst.msk [vmem:[%s3084_s5 + $0x50] sm:$0xff] %vm1353_vm3, %v1331_v30  ;;  %v1329_v2 = vsel %vm1320_vm0, %v2760_v37, %v1472_v51  ;;  %v1473_v48 = vadd.f32 -0.001, %v1265_v27  ;;  %v1176_v10 = vadd.f32 1.0, %v1811_v15  ;;  %v1458_v12 = vmul.f32 -1.442695, %v2880_v57 }
 0x25c   :  { %v1034_v38 = vpop.f32.mrb[27].mxu1  ;;  %v1815_v9 = vpop.eup %1814  ;;  %1362 = vst.msk [vmem:[%s3084_s5 + $0x40] sm:$0xff] %vm1353_vm3, %v1329_v2  ;;  %v1332_v7 = vsel %vm1320_vm0, %v2764_v39, %v1475_v17  ;;  %1832 = vrcp.f32 %v1178_v44  ;;  %v1179_v61 = vadd.f32 1.0, %v1813_v24  ;;  %v2901_v26 = vadd.f32 %v2722_v3, %v1031_v33 }
 0x25d   :  { %v1817_v37 = vpop.eup %1816  ;;  %1365 = vst.msk [vmem:[%s3084_s5 + $0x58] sm:$0xff] %vm1353_vm3, %v1332_v7  ;;  %v1330_v22 = vsel %vm1320_vm0, %v2768_v56, %v1473_v48  ;;  %1834 = vrcp.f32 %v1176_v10  ;;  %v1177_v11 = vadd.f32 1.0, %v1815_v9  ;;  %v2911_v46 = vadd.f32 %v1611_v62, %v2722_v3 }
 0x25e   :  { %v1819_v39 = vpop.eup %1818  ;;  %1363 = vst.msk [vmem:[%s3084_s5 + $0x48] sm:$0xff] %vm1353_vm3, %v1330_v22  ;;  %v1270_v6 = vmul.f32 1.002, %v1817_v37  ;;  %1836 = vrcp.f32 %v1179_v61  ;;  %v1456_v55 = vmul.f32 -1.442695, %v2901_v26  ;;  %v2919_v36 = vadd.f32 %v2722_v3, %v1034_v38 }
 0x25f   :  { %v1821_v28 = vpop.eup %1820  ;;  %v1268_v56 = vmul.f32 1.002, %v1819_v39  ;;  %1838 = vrcp.f32 %v1177_v11  ;;  %v1459_v31 = vmul.f32 -1.442695, %v2911_v46 }
 0x260   :  { %v1823_v34 = vpop.eup %1822  ;;  %v1478_v14 = vadd.f32 -0.001, %v1270_v6  ;;  %v1271_v5 = vmul.f32 1.002, %v1821_v28  ;;  %1840 = vpow2.f32 %v1458_v12  ;;  %v1457_v32 = vmul.f32 -1.442695, %v2919_v36 }
 0x261   :  { %v1825_v23 = vpop.eup %1824  ;;  %v1476_v20 = vadd.f32 -0.001, %v1268_v56  ;;  %v1269_v41 = vmul.f32 1.002, %v1823_v34  ;;  %1842 = vpow2.f32 %v1456_v55  ;;  %v1614_v21 = vpop.f32.mrb[28].mxu1 }
 0x262   :  { %v1827_v47 = vpop.eup %1826  ;;  %v1335_v25 = vsel %vm1320_vm0, %v2773_v18, %v1478_v14  ;;  %v1479_v63 = vadd.f32 -0.001, %v1271_v5  ;;  %v1182_v13 = vadd.f32 1.0, %v1825_v23  ;;  %1844 = vpow2.f32 %v1459_v31  ;;  %v1047_v16 = vpop.f32.mrb[29].mxu1 }
 0x263   :  { %v1829_v0 = vpop.eup %1828  ;;  %1368 = vst.msk [vmem:[%s3084_s5 + $0x70] sm:$0xff] %vm1353_vm3, %v1335_v25  ;;  %v1333_v42 = vsel %vm1320_vm0, %v2778_v60, %v1476_v20  ;;  %v1477_v53 = vadd.f32 -0.001, %v1269_v41  ;;  %v1180_v54 = vadd.f32 1.0, %v1827_v47  ;;  %1846 = vpow2.f32 %v1457_v32  ;;  %v1615_v1 = vpop.f32.mrb[30].mxu1 }
 0x264   :  { %v1831_v40 = vpop.eup %1830  ;;  %1366 = vst.msk [vmem:[%s3084_s5 + $0x60] sm:$0xff] %vm1353_vm3, %v1333_v42  ;;  %v1336_v18 = vsel %vm1320_vm0, %v2782_v49, %v1479_v63  ;;  %1848 = vrcp.f32 %v1182_v13  ;;  %v1183_v58 = vadd.f32 1.0, %v1829_v0  ;;  %v2941_v51 = vadd.f32 %v1614_v21, %v2722_v3  ;;  %v1050_v60 = vpop.f32.mrb[31].mxu1 }
 0x265   :  { %1369 = vst.msk [vmem:[%s3084_s5 + $0x78] sm:$0xff] %vm1353_vm3, %v1336_v18  ;;  %v1334_v27 = vsel %vm1320_vm0, %v2786_v4, %v1477_v53  ;;  %1850 = vrcp.f32 %v1180_v54  ;;  %v1181_v33 = vadd.f32 1.0, %v1831_v40  ;;  %v2951_v15 = vadd.f32 %v2722_v3, %v1047_v16 }
 0x266   :  { %v1833_v49 = vpop.eup %1832  ;;  %1367 = vst.msk [vmem:[%s3084_s5 + $0x68] sm:$0xff] %vm1353_vm3, %v1334_v27  ;;  %1852 = vrcp.f32 %v1183_v58  ;;  %v1462_v30 = vmul.f32 -1.442695, %v2941_v51  ;;  %v2959_v17 = vadd.f32 %v1615_v1, %v2722_v3  ;;  %v2962_v44 = vadd.f32 %v2722_v3, %v1050_v60 }
 0x267   :  { %v1835_v4 = vpop.eup %1834  ;;  %v1274_v62 = vmul.f32 1.002, %v1833_v49  ;;  %1854 = vrcp.f32 %v1181_v33  ;;  %v1460_v24 = vmul.f32 -1.442695, %v2951_v15 }
 0x268   :  { %v1837_v2 = vpop.eup %1836  ;;  %v1272_v48 = vmul.f32 1.002, %v1835_v4  ;;  %1856 = vpow2.f32 %v1462_v30  ;;  %v1463_v10 = vmul.f32 -1.442695, %v2959_v17  ;;  %v1461_v12 = vmul.f32 -1.442695, %v2962_v44 }
 0x269   :  { %v1839_v38 = vpop.eup %1838  ;;  %v1482_v9 = vadd.f32 -0.001, %v1274_v62  ;;  %v1275_v7 = vmul.f32 1.002, %v1837_v2  ;;  %1858 = vpow2.f32 %v1460_v24 }
 0x26a   :  { %v1841_v61 = vpop.eup %1840  ;;  %v1480_v37 = vadd.f32 -0.001, %v1272_v48  ;;  %v1273_v3 = vmul.f32 1.002, %v1839_v38  ;;  %1860 = vpow2.f32 %v1463_v10 }
 0x26b   :  { %v1843_v22 = vpop.eup %1842  ;;  %v1339_v11 = vsel %vm1320_vm0, %v2802_v8, %v1482_v9  ;;  %v1483_v39 = vadd.f32 -0.001, %v1275_v7  ;;  %v1186_v6 = vadd.f32 1.0, %v1841_v61  ;;  %1862 = vpow2.f32 %v1461_v12 }
 0x26c   :  { %v1845_v55 = vpop.eup %1844  ;;  %1372 = vst.msk [vmem:[%s3084_s5 + $0x90] sm:$0xff] %vm1353_vm3, %v1339_v11  ;;  %v1337_v28 = vsel %vm1320_vm0, %v2812_v29, %v1480_v37  ;;  %v1481_v56 = vadd.f32 -0.001, %v1273_v3  ;;  %v1184_v31 = vadd.f32 1.0, %v1843_v22 }
 0x26d   :  { %v1847_v34 = vpop.eup %1846  ;;  %1370 = vst.msk [vmem:[%s3084_s5 + $0x80] sm:$0xff] %vm1353_vm3, %v1337_v28  ;;  %v1340_v8 = vsel %vm1320_vm0, %v2828_v45, %v1483_v39  ;;  %1864 = vrcp.f32 %v1186_v6  ;;  %v1187_v14 = vadd.f32 1.0, %v1845_v55 }
 0x26e   :  { %v1849_v5 = vpop.eup %1848  ;;  %1373 = vst.msk [vmem:[%s3084_s5 + $0x98] sm:$0xff] %vm1353_vm3, %v1340_v8  ;;  %v1338_v29 = vsel %vm1320_vm0, %v2831_v43, %v1481_v56  ;;  %1866 = vrcp.f32 %v1184_v31  ;;  %v1185_v32 = vadd.f32 1.0, %v1847_v34 }
 0x26f   :  { %v1851_v23 = vpop.eup %1850  ;;  %1371 = vst.msk [vmem:[%s3084_s5 + $0x88] sm:$0xff] %vm1353_vm3, %v1338_v29  ;;  %v1278_v45 = vmul.f32 1.002, %v1849_v5  ;;  %1868 = vrcp.f32 %v1187_v14 }
 0x270   :  { %v1853_v20 = vpop.eup %1852  ;;  %v1276_v41 = vmul.f32 1.002, %v1851_v23  ;;  %1870 = vrcp.f32 %v1185_v32 }
 0x271   :  { %v1855_v21 = vpop.eup %1854  ;;  %v1486_v47 = vadd.f32 -0.001, %v1278_v45  ;;  %v1279_v25 = vmul.f32 1.002, %v1853_v20 }
 0x272   :  { %v1857_v63 = vpop.eup %1856  ;;  %v1484_v13 = vadd.f32 -0.001, %v1276_v41  ;;  %v1277_v16 = vmul.f32 1.002, %v1855_v21 }
 0x273   :  { %v1859_v43 = vpop.eup %1858  ;;  %v1343_v0 = vsel %vm1320_vm0, %v2853_v50, %v1486_v47  ;;  %v1487_v42 = vadd.f32 -0.001, %v1279_v25  ;;  %v1190_v53 = vadd.f32 1.0, %v1857_v63 }
 0x274   :  { %v1861_v54 = vpop.eup %1860  ;;  %1376 = vst.msk [vmem:[%s3084_s5 + $0xb0] sm:$0xff] %vm1353_vm3, %v1343_v0  ;;  %v1341_v1 = vsel %vm1320_vm0, %v2863_v19, %v1484_v13  ;;  %v1485_v40 = vadd.f32 -0.001, %v1277_v16  ;;  %v1188_v18 = vadd.f32 1.0, %v1859_v43 }
 0x275   :  { %v1863_v58 = vpop.eup %1862  ;;  %1374 = vst.msk [vmem:[%s3084_s5 + $0xa0] sm:$0xff] %vm1353_vm3, %v1341_v1  ;;  %v1344_v50 = vsel %vm1320_vm0, %v2871_v59, %v1487_v42  ;;  %1872 = vrcp.f32 %v1190_v53  ;;  %v1191_v60 = vadd.f32 1.0, %v1861_v54 }
 0x276   :  { %1377 = vst.msk [vmem:[%s3084_s5 + $0xb8] sm:$0xff] %vm1353_vm3, %v1344_v50  ;;  %v1342_v19 = vsel %vm1320_vm0, %v2874_v35, %v1485_v40  ;;  %1874 = vrcp.f32 %v1188_v18  ;;  %v1189_v27 = vadd.f32 1.0, %v1863_v58 }
 0x277   :  { %v1865_v33 = vpop.eup %1864  ;;  %1375 = vst.msk [vmem:[%s3084_s5 + $0xa8] sm:$0xff] %vm1353_vm3, %v1342_v19  ;;  %1876 = vrcp.f32 %v1191_v60 }
 0x278   :  { %v1867_v59 = vpop.eup %1866  ;;  %v1282_v49 = vmul.f32 1.002, %v1865_v33  ;;  %1878 = vrcp.f32 %v1189_v27 }
 0x279   :  { %v1869_v30 = vpop.eup %1868  ;;  %v1280_v4 = vmul.f32 1.002, %v1867_v59 }
 0x27a   :  { %v1871_v62 = vpop.eup %1870  ;;  %v1490_v24 = vadd.f32 -0.001, %v1282_v49  ;;  %v1283_v2 = vmul.f32 1.002, %v1869_v30 }
 0x27b   :  { %v1488_v48 = vadd.f32 -0.001, %v1280_v4  ;;  %v1281_v10 = vmul.f32 1.002, %v1871_v62 }
 0x27c   :  { %v1347_v35 = vsel %vm1320_vm0, %v2880_v57, %v1490_v24  ;;  %v1491_v12 = vadd.f32 -0.001, %v1283_v2 }
 0x27d   :  { %1380 = vst.msk [vmem:[%s3084_s5 + $0xd0] sm:$0xff] %vm1353_vm3, %v1347_v35  ;;  %v1345_v38 = vsel %vm1320_vm0, %v2901_v26, %v1488_v48  ;;  %v1489_v9 = vadd.f32 -0.001, %v1281_v10 }
 0x27e   :  { %1378 = vst.msk [vmem:[%s3084_s5 + $0xc0] sm:$0xff] %vm1353_vm3, %v1345_v38  ;;  %v1348_v57 = vsel %vm1320_vm0, %v2911_v46, %v1491_v12 }
 0x27f   :  { %v1873_v7 = vpop.eup %1872  ;;  %1381 = vst.msk [vmem:[%s3084_s5 + $0xd8] sm:$0xff] %vm1353_vm3, %v1348_v57  ;;  %v1346_v26 = vsel %vm1320_vm0, %v2919_v36, %v1489_v9 }
 0x280   :  { %v1875_v61 = vpop.eup %1874  ;;  %1379 = vst.msk [vmem:[%s3084_s5 + $0xc8] sm:$0xff] %vm1353_vm3, %v1346_v26  ;;  %v1286_v37 = vmul.f32 1.002, %v1873_v7 }
 0x281   :  { %v1877_v3 = vpop.eup %1876  ;;  %v1284_v22 = vmul.f32 1.002, %v1875_v61 }
 0x282   :  { %v1879_v46 = vpop.eup %1878  ;;  %v1494_v11 = vadd.f32 -0.001, %v1286_v37  ;;  %v1287_v39 = vmul.f32 1.002, %v1877_v3 }
 0x283   :  { %v1492_v6 = vadd.f32 -0.001, %v1284_v22  ;;  %v1285_v55 = vmul.f32 1.002, %v1879_v46 }
 0x284   :  { %v1351_v28 = vsel %vm1320_vm0, %v2941_v51, %v1494_v11  ;;  %v1495_v56 = vadd.f32 -0.001, %v1287_v39 }
 0x285   :  { %1384 = vst.msk [vmem:[%s3084_s5 + $0xf0] sm:$0xff] %vm1353_vm3, %v1351_v28  ;;  %v1349_v36 = vsel %vm1320_vm0, %v2951_v15, %v1492_v6  ;;  %v1493_v31 = vadd.f32 -0.001, %v1285_v55 }
 0x286   :  { %1382 = vst.msk [vmem:[%s3084_s5 + $0xe0] sm:$0xff] %vm1353_vm3, %v1349_v36  ;;  %v1352_v51 = vsel %vm1320_vm0, %v2959_v17, %v1495_v56 }
 0x287   :  { %1385 = vst.msk [vmem:[%s3084_s5 + $0xf8] sm:$0xff] %vm1353_vm3, %v1352_v51  ;;  %v1350_v34 = vsel %vm1320_vm0, %v2962_v44, %v1493_v31 }
 0x288   :  { %1383 = vst.msk [vmem:[%s3084_s5 + $0xe8] sm:$0xff] %vm1353_vm3, %v1350_v34 }

</bundles_post_ra>
